<compile_context>
chip_gen: v6e
topology: v6e:2x2x1
jax: 0.10.0
libtpu: 0.0.40
codegen_flags: <defaults>
</compile_context>

<pallas_src>
import functools
import math

import jax
import jax.numpy as jnp
from jax.experimental import pallas as pl
from jax.experimental.pallas import tpu as pltpu


def _round_up(x, m):
    return (x + m - 1) // m * m


# ----------------------------- fused projection-head kernel -----------------------------

def _proj_head_kernel(x_ref, w1_ref, g1_ref, b1_ref, w2_ref, g2_ref, b2_ref, o_ref,
                      *, odim, eps):
    # x_ref : (tm, K)     input dtype (cast to weight dtype in-kernel, in VMEM)
    # w1_ref: (K, N_p)    compute dtype, PRE-transposed, cols >= odim are zero
    # w2_ref: (N_p, N_p)  compute dtype, PRE-transposed, rows/cols >= odim are zero
    # g*/b* : (1, N_p)    f32, entries >= odim are zero
    # o_ref : (tm, N_p)   lane-dense (N_p is a multiple of 128)
    inv_n = 1.0 / odim

    def ln_relu(h, g, b):
        # Padded lanes of h are exactly 0 (zero weight columns, no bias), so unmasked sums
        # divided by the true odim are exact; padded outputs stay 0 because g = b = 0 there.
        mu = jnp.sum(h, axis=-1, keepdims=True) * inv_n
        var = jnp.sum(h * h, axis=-1, keepdims=True) * inv_n - mu * mu
        y = (h - mu) * jax.lax.rsqrt(var + eps) * g + b
        return jnp.maximum(y, 0.0)

    x = x_ref[...].astype(w1_ref.dtype)                       # VPU cast, no extra HBM pass
    h1 = jnp.dot(x, w1_ref[...], preferred_element_type=jnp.float32)       # (tm, N_p) f32
    y1 = ln_relu(h1, g1_ref[...], b1_ref[...])
    h2 = jnp.dot(y1.astype(w2_ref.dtype), w2_ref[...],
                 preferred_element_type=jnp.float32)                       # (tm, N_p) f32
    y2 = ln_relu(h2, g2_ref[...], b2_ref[...])
    o_ref[...] = y2.astype(o_ref.dtype)


# ----------------------------- host-side wrappers ----------------------------------------

def prepare_params(params, compute_dtype=jnp.bfloat16):
    """One-time (init-time) transpose + pad + cast of the head parameters.

    params: PyTorch-layout dict
        w1: (odim, K)   w2: (odim, odim)   g1, b1, g2, b2: (odim,)
    Returns matmul weights pre-transposed to (in, out) layout with odim padded to a
    lane-dense multiple of 128 (zeros in the padding), LN params padded in f32.
    """
    odim, K = params["w1"].shape
    n_p = _round_up(max(odim, 128), 128)

    w1 = jnp.zeros((K, n_p), compute_dtype).at[:, :odim].set(
        params["w1"].T.astype(compute_dtype))
    w2 = jnp.zeros((n_p, n_p), compute_dtype).at[:odim, :odim].set(
        params["w2"].T.astype(compute_dtype))

    def pad_vec(v):
        return jnp.zeros((1, n_p), jnp.float32).at[0, :odim].set(v.astype(jnp.float32))

    return dict(w1=w1, w2=w2,
                g1=pad_vec(params["g1"]), b1=pad_vec(params["b1"]),
                g2=pad_vec(params["g2"]), b2=pad_vec(params["b2"]))


def simple_projection_head(z, prepared, *, odim, eps=1e-5, block_m=512,
                           out_dtype=jnp.float32, single_buffer_weights=True):
    """Forward pass.  z: (B, n_tokens, d_model) -> (B, odim)."""
    B = z.shape[0]
    x2 = z.reshape(B, -1)                       # the nn.Module's z.view(B, -1): free view,
    K = x2.shape[1]                             # native dtype (no wrapper cast/pad pass)
    n_p = prepared["w1"].shape[1]

    x_bytes = jnp.dtype(x2.dtype).itemsize
    w_bytes = jnp.dtype(prepared["w1"].dtype).itemsize
    o_bytes = jnp.dtype(out_dtype).itemsize

    # ---------------- M-tile selection ----------------
    granule = 8                                 # f32 sublane granule
    block_m = _round_up(max(block_m, granule), granule)
    tm = min(block_m, _round_up(B, granule))
    if tm >= B and B > granule:                 # guarantee >=2 grid steps (v7x megacore,
        tm = _round_up(pl.cdiv(B, 2), granule)  # and lets the pipeline actually overlap)

    w_bufs = 1 if single_buffer_weights else 2

    def footprint(t):                           # VMEM bytes actually held
        xb = 2 * t * K * x_bytes                # x double buffer
        ob = 2 * t * n_p * o_bytes              # out double buffer
        wb = w_bufs * (K * n_p + n_p * n_p) * w_bytes
        lb = w_bufs * 4 * n_p * 4               # LN params
        return xb + ob + wb + lb

    vmem_budget = 40 * 1024 * 1024              # conservative vs v7x's 64 MiB physical VMEM
    while tm > granule and footprint(tm) > vmem_budget:
        tm = max(granule, _round_up(tm // 2, granule))
    # TODO(synk): if K is so large that even tm=8 overflows the budget, add a K reduction
    # grid axis (last, "arbitrary") with a (tm, n_p) f32 scratch accumulator.

    grid = (pl.cdiv(B, tm),)                    # partial last tile OK: rows independent,
                                                # padded rows are never returned
    vmem_limit = int(min(max(32 * 1024 * 1024, footprint(tm) + (16 << 20)),
                         60 * 1024 * 1024))

    const = lambda i: (0, 0)
    if single_buffer_weights:
        res = lambda shape: pl.BlockSpec(shape, const, pipeline_mode=pl.Buffered(1))
    else:
        res = lambda shape: pl.BlockSpec(shape, const)

    out = pl.pallas_call(
        functools.partial(_proj_head_kernel, odim=odim, eps=eps),
        out_shape=jax.ShapeDtypeStruct((B, n_p), out_dtype),
        grid=grid,
        in_specs=[
            pl.BlockSpec((tm, K), lambda i: (i, 0)),   # x rows (double-buffered pipeline)
            res((K, n_p)),                             # w1 (pre-transposed, resident)
            res((1, n_p)),                             # g1
            res((1, n_p)),                             # b1
            res((n_p, n_p)),                           # w2 (pre-transposed, resident)
            res((1, n_p)),                             # g2
            res((1, n_p)),                             # b2
        ],
        out_specs=pl.BlockSpec((tm, n_p), lambda i: (i, 0)),
        compiler_params=pltpu.CompilerParams(
            dimension_semantics=("parallel",),         # shard M tiles across TCs
            vmem_limit_bytes=vmem_limit,
        ),
    )(x2, prepared["w1"], prepared["g1"], prepared["b1"],
      prepared["w2"], prepared["g2"], prepared["b2"])

    return out[:, :odim]                        # drop lane padding


# ----------------------------- pure-JAX reference (f32) ----------------------------------

def reference_forward(z, params, eps=1e-5):
    x = z.reshape(z.shape[0], -1)

    def ln(h, g, b):
        mu = jnp.mean(h, axis=-1, keepdims=True)
        var = jnp.mean((h - mu) ** 2, axis=-1, keepdims=True)
        return (h - mu) * jax.lax.rsqrt(var + eps) * g + b

    h = x @ params["w1"].T
    h = jnp.maximum(ln(h, params["g1"], params["b1"]), 0.0)
    h = h @ params["w2"].T
    return jnp.maximum(ln(h, params["g2"], params["b2"]), 0.0)


# ----------------------------- demo -------------------------------------------------------

if __name__ == "__main__":
    # Small shapes consistent with SimpleProjectionHead(d_model, n_tokens, odim).
    d_model, n_tokens, odim = 128, 12, 50
    B = 16
    K = d_model * n_tokens

    key = jax.random.PRNGKey(0)
    kz, kw1, kw2 = jax.random.split(key, 3)
    z = jax.random.normal(kz, (B, n_tokens, d_model), jnp.float32)

    params = dict(
        w1=jax.random.normal(kw1, (odim, K), jnp.float32) / math.sqrt(K),
        g1=jnp.ones((odim,), jnp.float32), b1=jnp.zeros((odim,), jnp.float32),
        w2=jax.random.normal(kw2, (odim, odim), jnp.float32) / math.sqrt(odim),
        g2=jnp.ones((odim,), jnp.float32), b2=jnp.zeros((odim,), jnp.float32),
    )

    prepared = prepare_params(params)            # one-time transpose + pad + bf16 cast

    def make_fwd(single_buffer_weights):
        return jax.jit(functools.partial(simple_projection_head, odim=odim,
                                         single_buffer_weights=single_buffer_weights))

    try:
        out = jax.block_until_ready(make_fwd(True)(z, prepared))
    except Exception:
        # Fallback if this jax build rejects single-buffered (Buffered(1)) resident specs.
        out = jax.block_until_ready(make_fwd(False)(z, prepared))

    assert out.shape == (B, odim), out.shape
    assert bool(jnp.all(jnp.isfinite(out)))

    ref = reference_forward(z, params)
    err = float(jnp.max(jnp.abs(out - ref)))
    assert err < 0.1, f"max abs error vs f32 reference too large: {err}"

    print("KERNEL_OK")
</pallas_src>

<mosaic_0001>
module attributes {stable_mosaic.version = 11 : i64} {
  func.func @_proj_head_kernel(%arg0: i32, %arg1: memref<8x1536xf32, #tpu.memory_space<vmem>>, %arg2: memref<1536x128xbf16, #tpu.memory_space<vmem>>, %arg3: memref<1x128xf32, #tpu.memory_space<vmem>>, %arg4: memref<1x128xf32, #tpu.memory_space<vmem>>, %arg5: memref<128x128xbf16, #tpu.memory_space<vmem>>, %arg6: memref<1x128xf32, #tpu.memory_space<vmem>>, %arg7: memref<1x128xf32, #tpu.memory_space<vmem>>, %arg8: memref<8x128xf32, #tpu.memory_space<vmem>>) attributes {dimension_semantics = [#tpu.dimension_semantics<parallel>], iteration_bounds = array<i64: 2>, scalar_prefetch = 0 : i64, scratch_operands = 0 : i64, tpu.core_type = #tpu.core_type<tc>, window_params = [{transform_indices = @transform_0, window_bounds = array<i64: 8, 1536>}, {pipeline_mode = #tpu.pipeline_mode<synchronous>, transform_indices = @transform_1, window_bounds = array<i64: 1536, 128>}, {pipeline_mode = #tpu.pipeline_mode<synchronous>, transform_indices = @transform_2, window_bounds = array<i64: 1, 128>}, {pipeline_mode = #tpu.pipeline_mode<synchronous>, transform_indices = @transform_3, window_bounds = array<i64: 1, 128>}, {pipeline_mode = #tpu.pipeline_mode<synchronous>, transform_indices = @transform_4, window_bounds = array<i64: 128, 128>}, {pipeline_mode = #tpu.pipeline_mode<synchronous>, transform_indices = @transform_5, window_bounds = array<i64: 1, 128>}, {pipeline_mode = #tpu.pipeline_mode<synchronous>, transform_indices = @transform_6, window_bounds = array<i64: 1, 128>}, {transform_indices = @transform_7, window_bounds = array<i64: 8, 128>}]} {
    %c0 = arith.constant 0 : index
    %c0_0 = arith.constant 0 : index
    %0 = vector.load %arg1[%c0, %c0_0] : memref<8x1536xf32, #tpu.memory_space<vmem>>, vector<8x1536xf32>
    %1 = arith.truncf %0 : vector<8x1536xf32> to vector<8x1536xbf16>
    %c0_1 = arith.constant 0 : index
    %c0_2 = arith.constant 0 : index
    %2 = vector.load %arg2[%c0_1, %c0_2] : memref<1536x128xbf16, #tpu.memory_space<vmem>>, vector<1536x128xbf16>
    %cst = arith.constant dense<0.000000e+00> : vector<8x128xf32>
    %3 = tpu.matmul %1, %2, %cst {dimension_numbers = #tpu.dot_dimension_numbers<[1], [0], [0], [1], [0, 0, 1, 1], [], []>} : vector<8x1536xbf16>, vector<1536x128xbf16>, vector<8x128xf32> -> vector<8x128xf32>
    %c0_3 = arith.constant 0 : index
    %c0_4 = arith.constant 0 : index
    %4 = vector.load %arg3[%c0_3, %c0_4] : memref<1x128xf32, #tpu.memory_space<vmem>>, vector<1x128xf32>
    %c0_5 = arith.constant 0 : index
    %c0_6 = arith.constant 0 : index
    %5 = vector.load %arg4[%c0_5, %c0_6] : memref<1x128xf32, #tpu.memory_space<vmem>>, vector<1x128xf32>
    %cst_7 = arith.constant dense<0.000000e+00> : vector<8xf32>
    %6 = vector.multi_reduction <add>, %3, %cst_7 [1] : vector<8x128xf32> to vector<8xf32>
    %7 = vector.shape_cast %6 : vector<8xf32> to vector<8x1xf32>
    %cst_8 = arith.constant 2.000000e-02 : f32
    %8 = vector.broadcast %cst_8 : f32 to vector<8x1xf32>
    %9 = arith.mulf %7, %8 : vector<8x1xf32>
    %10 = arith.mulf %3, %3 : vector<8x128xf32>
    %cst_9 = arith.constant dense<0.000000e+00> : vector<8xf32>
    %11 = vector.multi_reduction <add>, %10, %cst_9 [1] : vector<8x128xf32> to vector<8xf32>
    %12 = vector.shape_cast %11 : vector<8xf32> to vector<8x1xf32>
    %cst_10 = arith.constant 2.000000e-02 : f32
    %13 = vector.broadcast %cst_10 : f32 to vector<8x1xf32>
    %14 = arith.mulf %12, %13 : vector<8x1xf32>
    %15 = arith.mulf %9, %9 : vector<8x1xf32>
    %16 = arith.subf %14, %15 : vector<8x1xf32>
    %17 = vector.broadcast %9 : vector<8x1xf32> to vector<8x128xf32>
    %18 = arith.subf %3, %17 : vector<8x128xf32>
    %cst_11 = arith.constant 9.99999974E-6 : f32
    %19 = vector.broadcast %cst_11 : f32 to vector<8x1xf32>
    %20 = arith.addf %16, %19 : vector<8x1xf32>
    %21 = math.rsqrt %20 : vector<8x1xf32>
    %22 = vector.broadcast %21 : vector<8x1xf32> to vector<8x128xf32>
    %23 = arith.mulf %18, %22 : vector<8x128xf32>
    %24 = vector.broadcast %4 : vector<1x128xf32> to vector<8x128xf32>
    %25 = arith.mulf %23, %24 : vector<8x128xf32>
    %26 = vector.broadcast %5 : vector<1x128xf32> to vector<8x128xf32>
    %27 = arith.addf %25, %26 : vector<8x128xf32>
    %cst_12 = arith.constant 0.000000e+00 : f32
    %28 = vector.broadcast %cst_12 : f32 to vector<8x128xf32>
    %29 = arith.maximumf %27, %28 : vector<8x128xf32>
    %30 = arith.truncf %29 : vector<8x128xf32> to vector<8x128xbf16>
    %c0_13 = arith.constant 0 : index
    %c0_14 = arith.constant 0 : index
    %31 = vector.load %arg5[%c0_13, %c0_14] : memref<128x128xbf16, #tpu.memory_space<vmem>>, vector<128x128xbf16>
    %cst_15 = arith.constant dense<0.000000e+00> : vector<8x128xf32>
    %32 = tpu.matmul %30, %31, %cst_15 {dimension_numbers = #tpu.dot_dimension_numbers<[1], [0], [0], [1], [0, 0, 1, 1], [], []>} : vector<8x128xbf16>, vector<128x128xbf16>, vector<8x128xf32> -> vector<8x128xf32>
    %c0_16 = arith.constant 0 : index
    %c0_17 = arith.constant 0 : index
    %33 = vector.load %arg6[%c0_16, %c0_17] : memref<1x128xf32, #tpu.memory_space<vmem>>, vector<1x128xf32>
    %c0_18 = arith.constant 0 : index
    %c0_19 = arith.constant 0 : index
    %34 = vector.load %arg7[%c0_18, %c0_19] : memref<1x128xf32, #tpu.memory_space<vmem>>, vector<1x128xf32>
    %cst_20 = arith.constant dense<0.000000e+00> : vector<8xf32>
    %35 = vector.multi_reduction <add>, %32, %cst_20 [1] : vector<8x128xf32> to vector<8xf32>
    %36 = vector.shape_cast %35 : vector<8xf32> to vector<8x1xf32>
    %cst_21 = arith.constant 2.000000e-02 : f32
    %37 = vector.broadcast %cst_21 : f32 to vector<8x1xf32>
    %38 = arith.mulf %36, %37 : vector<8x1xf32>
    %39 = arith.mulf %32, %32 : vector<8x128xf32>
    %cst_22 = arith.constant dense<0.000000e+00> : vector<8xf32>
    %40 = vector.multi_reduction <add>, %39, %cst_22 [1] : vector<8x128xf32> to vector<8xf32>
    %41 = vector.shape_cast %40 : vector<8xf32> to vector<8x1xf32>
    %cst_23 = arith.constant 2.000000e-02 : f32
    %42 = vector.broadcast %cst_23 : f32 to vector<8x1xf32>
    %43 = arith.mulf %41, %42 : vector<8x1xf32>
    %44 = arith.mulf %38, %38 : vector<8x1xf32>
    %45 = arith.subf %43, %44 : vector<8x1xf32>
    %46 = vector.broadcast %38 : vector<8x1xf32> to vector<8x128xf32>
    %47 = arith.subf %32, %46 : vector<8x128xf32>
    %cst_24 = arith.constant 9.99999974E-6 : f32
    %48 = vector.broadcast %cst_24 : f32 to vector<8x1xf32>
    %49 = arith.addf %45, %48 : vector<8x1xf32>
    %50 = math.rsqrt %49 : vector<8x1xf32>
    %51 = vector.broadcast %50 : vector<8x1xf32> to vector<8x128xf32>
    %52 = arith.mulf %47, %51 : vector<8x128xf32>
    %53 = vector.broadcast %33 : vector<1x128xf32> to vector<8x128xf32>
    %54 = arith.mulf %52, %53 : vector<8x128xf32>
    %55 = vector.broadcast %34 : vector<1x128xf32> to vector<8x128xf32>
    %56 = arith.addf %54, %55 : vector<8x128xf32>
    %cst_25 = arith.constant 0.000000e+00 : f32
    %57 = vector.broadcast %cst_25 : f32 to vector<8x128xf32>
    %58 = arith.maximumf %56, %57 : vector<8x128xf32>
    %c0_26 = arith.constant 0 : index
    %c0_27 = arith.constant 0 : index
    %59 = vector.load %arg8[%c0_26, %c0_27] : memref<8x128xf32, #tpu.memory_space<vmem>>, vector<8x128xf32>
    tpu.vector_store %arg8[%c0_26, %c0_27], %58 {strides = array<i32>} : memref<8x128xf32, #tpu.memory_space<vmem>>, vector<8x128xf32>,
    return
  }
  func.func @transform_0(%arg0: i32) -> (i32, i32) {
    %c0_i32 = arith.constant 0 : i32
    %c0_i32_0 = arith.constant 0 : i32
    return %arg0, %c0_i32 : i32, i32
  }
  func.func @transform_1(%arg0: i32) -> (i32, i32) {
    %c0_i32 = arith.constant 0 : i32
    %c0_i32_0 = arith.constant 0 : i32
    %c0_i32_1 = arith.constant 0 : i32
    return %c0_i32, %c0_i32_0 : i32, i32
  }
  func.func @transform_2(%arg0: i32) -> (i32, i32) {
    %c0_i32 = arith.constant 0 : i32
    %c0_i32_0 = arith.constant 0 : i32
    %c0_i32_1 = arith.constant 0 : i32
    return %c0_i32, %c0_i32_0 : i32, i32
  }
  func.func @transform_3(%arg0: i32) -> (i32, i32) {
    %c0_i32 = arith.constant 0 : i32
    %c0_i32_0 = arith.constant 0 : i32
    %c0_i32_1 = arith.constant 0 : i32
    return %c0_i32, %c0_i32_0 : i32, i32
  }
  func.func @transform_4(%arg0: i32) -> (i32, i32) {
    %c0_i32 = arith.constant 0 : i32
    %c0_i32_0 = arith.constant 0 : i32
    %c0_i32_1 = arith.constant 0 : i32
    return %c0_i32, %c0_i32_0 : i32, i32
  }
  func.func @transform_5(%arg0: i32) -> (i32, i32) {
    %c0_i32 = arith.constant 0 : i32
    %c0_i32_0 = arith.constant 0 : i32
    %c0_i32_1 = arith.constant 0 : i32
    return %c0_i32, %c0_i32_0 : i32, i32
  }
  func.func @transform_6(%arg0: i32) -> (i32, i32) {
    %c0_i32 = arith.constant 0 : i32
    %c0_i32_0 = arith.constant 0 : i32
    %c0_i32_1 = arith.constant 0 : i32
    return %c0_i32, %c0_i32_0 : i32, i32
  }
  func.func @transform_7(%arg0: i32) -> (i32, i32) {
    %c0_i32 = arith.constant 0 : i32
    %c0_i32_0 = arith.constant 0 : i32
    return %arg0, %c0_i32 : i32, i32
  }
}

module attributes {stable_mosaic.version = 11 : i64} {
  func.func @_proj_head_kernel(%arg0: i32, %arg1: memref<8x1536xf32, #tpu.memory_space<vmem>>, %arg2: memref<1536x128xbf16, #tpu.memory_space<vmem>>, %arg3: memref<1x128xf32, #tpu.memory_space<vmem>>, %arg4: memref<1x128xf32, #tpu.memory_space<vmem>>, %arg5: memref<128x128xbf16, #tpu.memory_space<vmem>>, %arg6: memref<1x128xf32, #tpu.memory_space<vmem>>, %arg7: memref<1x128xf32, #tpu.memory_space<vmem>>, %arg8: memref<8x128xf32, #tpu.memory_space<vmem>>) attributes {dimension_semantics = [#tpu.dimension_semantics<parallel>], iteration_bounds = array<i64: 2>, scalar_prefetch = 0 : i64, scratch_operands = 0 : i64, tpu.core_type = #tpu.core_type<tc>, window_params = [{transform_indices = @transform_0, window_bounds = array<i64: 8, 1536>}, {pipeline_mode = #tpu.pipeline_mode<synchronous>, transform_indices = @transform_1, window_bounds = array<i64: 1536, 128>}, {pipeline_mode = #tpu.pipeline_mode<synchronous>, transform_indices = @transform_2, window_bounds = array<i64: 1, 128>}, {pipeline_mode = #tpu.pipeline_mode<synchronous>, transform_indices = @transform_3, window_bounds = array<i64: 1, 128>}, {pipeline_mode = #tpu.pipeline_mode<synchronous>, transform_indices = @transform_4, window_bounds = array<i64: 128, 128>}, {pipeline_mode = #tpu.pipeline_mode<synchronous>, transform_indices = @transform_5, window_bounds = array<i64: 1, 128>}, {pipeline_mode = #tpu.pipeline_mode<synchronous>, transform_indices = @transform_6, window_bounds = array<i64: 1, 128>}, {transform_indices = @transform_7, window_bounds = array<i64: 8, 128>}]} {
    %c0 = arith.constant 0 : index
    %c0_0 = arith.constant 0 : index
    %0 = vector.load %arg1[%c0, %c0_0] : memref<8x1536xf32, #tpu.memory_space<vmem>>, vector<8x1536xf32>
    %1 = arith.truncf %0 : vector<8x1536xf32> to vector<8x1536xbf16>
    %c0_1 = arith.constant 0 : index
    %c0_2 = arith.constant 0 : index
    %2 = vector.load %arg2[%c0_1, %c0_2] : memref<1536x128xbf16, #tpu.memory_space<vmem>>, vector<1536x128xbf16>
    %cst = arith.constant dense<0.000000e+00> : vector<8x128xf32>
    %3 = tpu.matmul %1, %2, %cst {dimension_numbers = #tpu.dot_dimension_numbers<[1], [0], [0], [1], [0, 0, 1, 1], [], []>} : vector<8x1536xbf16>, vector<1536x128xbf16>, vector<8x128xf32> -> vector<8x128xf32>
    %c0_3 = arith.constant 0 : index
    %c0_4 = arith.constant 0 : index
    %4 = vector.load %arg3[%c0_3, %c0_4] : memref<1x128xf32, #tpu.memory_space<vmem>>, vector<1x128xf32>
    %c0_5 = arith.constant 0 : index
    %c0_6 = arith.constant 0 : index
    %5 = vector.load %arg4[%c0_5, %c0_6] : memref<1x128xf32, #tpu.memory_space<vmem>>, vector<1x128xf32>
    %cst_7 = arith.constant dense<0.000000e+00> : vector<8xf32>
    %6 = vector.multi_reduction <add>, %3, %cst_7 [1] : vector<8x128xf32> to vector<8xf32>
    %7 = vector.shape_cast %6 : vector<8xf32> to vector<8x1xf32>
    %cst_8 = arith.constant 2.000000e-02 : f32
    %8 = vector.broadcast %cst_8 : f32 to vector<8x1xf32>
    %9 = arith.mulf %7, %8 : vector<8x1xf32>
    %10 = arith.mulf %3, %3 : vector<8x128xf32>
    %cst_9 = arith.constant dense<0.000000e+00> : vector<8xf32>
    %11 = vector.multi_reduction <add>, %10, %cst_9 [1] : vector<8x128xf32> to vector<8xf32>
    %12 = vector.shape_cast %11 : vector<8xf32> to vector<8x1xf32>
    %cst_10 = arith.constant 2.000000e-02 : f32
    %13 = vector.broadcast %cst_10 : f32 to vector<8x1xf32>
    %14 = arith.mulf %12, %13 : vector<8x1xf32>
    %15 = arith.mulf %9, %9 : vector<8x1xf32>
    %16 = arith.subf %14, %15 : vector<8x1xf32>
    %17 = vector.broadcast %9 : vector<8x1xf32> to vector<8x128xf32>
    %18 = arith.subf %3, %17 : vector<8x128xf32>
    %cst_11 = arith.constant 9.99999974E-6 : f32
    %19 = vector.broadcast %cst_11 : f32 to vector<8x1xf32>
    %20 = arith.addf %16, %19 : vector<8x1xf32>
    %21 = math.rsqrt %20 : vector<8x1xf32>
    %22 = vector.broadcast %21 : vector<8x1xf32> to vector<8x128xf32>
    %23 = arith.mulf %18, %22 : vector<8x128xf32>
    %24 = vector.broadcast %4 : vector<1x128xf32> to vector<8x128xf32>
    %25 = arith.mulf %23, %24 : vector<8x128xf32>
    %26 = vector.broadcast %5 : vector<1x128xf32> to vector<8x128xf32>
    %27 = arith.addf %25, %26 : vector<8x128xf32>
    %cst_12 = arith.constant 0.000000e+00 : f32
    %28 = vector.broadcast %cst_12 : f32 to vector<8x128xf32>
    %29 = arith.maximumf %27, %28 : vector<8x128xf32>
    %30 = arith.truncf %29 : vector<8x128xf32> to vector<8x128xbf16>
    %c0_13 = arith.constant 0 : index
    %c0_14 = arith.constant 0 : index
    %31 = vector.load %arg5[%c0_13, %c0_14] : memref<128x128xbf16, #tpu.memory_space<vmem>>, vector<128x128xbf16>
    %cst_15 = arith.constant dense<0.000000e+00> : vector<8x128xf32>
    %32 = tpu.matmul %30, %31, %cst_15 {dimension_numbers = #tpu.dot_dimension_numbers<[1], [0], [0], [1], [0, 0, 1, 1], [], []>} : vector<8x128xbf16>, vector<128x128xbf16>, vector<8x128xf32> -> vector<8x128xf32>
    %c0_16 = arith.constant 0 : index
    %c0_17 = arith.constant 0 : index
    %33 = vector.load %arg6[%c0_16, %c0_17] : memref<1x128xf32, #tpu.memory_space<vmem>>, vector<1x128xf32>
    %c0_18 = arith.constant 0 : index
    %c0_19 = arith.constant 0 : index
    %34 = vector.load %arg7[%c0_18, %c0_19] : memref<1x128xf32, #tpu.memory_space<vmem>>, vector<1x128xf32>
    %cst_20 = arith.constant dense<0.000000e+00> : vector<8xf32>
    %35 = vector.multi_reduction <add>, %32, %cst_20 [1] : vector<8x128xf32> to vector<8xf32>
    %36 = vector.shape_cast %35 : vector<8xf32> to vector<8x1xf32>
    %cst_21 = arith.constant 2.000000e-02 : f32
    %37 = vector.broadcast %cst_21 : f32 to vector<8x1xf32>
    %38 = arith.mulf %36, %37 : vector<8x1xf32>
    %39 = arith.mulf %32, %32 : vector<8x128xf32>
    %cst_22 = arith.constant dense<0.000000e+00> : vector<8xf32>
    %40 = vector.multi_reduction <add>, %39, %cst_22 [1] : vector<8x128xf32> to vector<8xf32>
    %41 = vector.shape_cast %40 : vector<8xf32> to vector<8x1xf32>
    %cst_23 = arith.constant 2.000000e-02 : f32
    %42 = vector.broadcast %cst_23 : f32 to vector<8x1xf32>
    %43 = arith.mulf %41, %42 : vector<8x1xf32>
    %44 = arith.mulf %38, %38 : vector<8x1xf32>
    %45 = arith.subf %43, %44 : vector<8x1xf32>
    %46 = vector.broadcast %38 : vector<8x1xf32> to vector<8x128xf32>
    %47 = arith.subf %32, %46 : vector<8x128xf32>
    %cst_24 = arith.constant 9.99999974E-6 : f32
    %48 = vector.broadcast %cst_24 : f32 to vector<8x1xf32>
    %49 = arith.addf %45, %48 : vector<8x1xf32>
    %50 = math.rsqrt %49 : vector<8x1xf32>
    %51 = vector.broadcast %50 : vector<8x1xf32> to vector<8x128xf32>
    %52 = arith.mulf %47, %51 : vector<8x128xf32>
    %53 = vector.broadcast %33 : vector<1x128xf32> to vector<8x128xf32>
    %54 = arith.mulf %52, %53 : vector<8x128xf32>
    %55 = vector.broadcast %34 : vector<1x128xf32> to vector<8x128xf32>
    %56 = arith.addf %54, %55 : vector<8x128xf32>
    %cst_25 = arith.constant 0.000000e+00 : f32
    %57 = vector.broadcast %cst_25 : f32 to vector<8x128xf32>
    %58 = arith.maximumf %56, %57 : vector<8x128xf32>
    %c0_26 = arith.constant 0 : index
    %c0_27 = arith.constant 0 : index
    %59 = vector.load %arg8[%c0_26, %c0_27] : memref<8x128xf32, #tpu.memory_space<vmem>>, vector<8x128xf32>
    tpu.vector_store %arg8[%c0_26, %c0_27], %58 {strides = array<i32>} : memref<8x128xf32, #tpu.memory_space<vmem>>, vector<8x128xf32>,
    return
  }
  func.func @transform_0(%arg0: i32) -> (i32, i32) {
    %c0_i32 = arith.constant 0 : i32
    %c0_i32_0 = arith.constant 0 : i32
    return %arg0, %c0_i32 : i32, i32
  }
  func.func @transform_1(%arg0: i32) -> (i32, i32) {
    %c0_i32 = arith.constant 0 : i32
    %c0_i32_0 = arith.constant 0 : i32
    %c0_i32_1 = arith.constant 0 : i32
    return %c0_i32, %c0_i32_0 : i32, i32
  }
  func.func @transform_2(%arg0: i32) -> (i32, i32) {
    %c0_i32 = arith.constant 0 : i32
    %c0_i32_0 = arith.constant 0 : i32
    %c0_i32_1 = arith.constant 0 : i32
    return %c0_i32, %c0_i32_0 : i32, i32
  }
  func.func @transform_3(%arg0: i32) -> (i32, i32) {
    %c0_i32 = arith.constant 0 : i32
    %c0_i32_0 = arith.constant 0 : i32
    %c0_i32_1 = arith.constant 0 : i32
    return %c0_i32, %c0_i32_0 : i32, i32
  }
  func.func @transform_4(%arg0: i32) -> (i32, i32) {
    %c0_i32 = arith.constant 0 : i32
    %c0_i32_0 = arith.constant 0 : i32
    %c0_i32_1 = arith.constant 0 : i32
    return %c0_i32, %c0_i32_0 : i32, i32
  }
  func.func @transform_5(%arg0: i32) -> (i32, i32) {
    %c0_i32 = arith.constant 0 : i32
    %c0_i32_0 = arith.constant 0 : i32
    %c0_i32_1 = arith.constant 0 : i32
    return %c0_i32, %c0_i32_0 : i32, i32
  }
  func.func @transform_6(%arg0: i32) -> (i32, i32) {
    %c0_i32 = arith.constant 0 : i32
    %c0_i32_0 = arith.constant 0 : i32
    %c0_i32_1 = arith.constant 0 : i32
    return %c0_i32, %c0_i32_0 : i32, i32
  }
  func.func @transform_7(%arg0: i32) -> (i32, i32) {
    %c0_i32 = arith.constant 0 : i32
    %c0_i32_0 = arith.constant 0 : i32
    return %arg0, %c0_i32 : i32, i32
  }
}

</mosaic_0001>

<bundles_post_ra>
// kernel: simple_projection_head.1
= control target key start
LH: loop header
LB: loop body
LE: loop exit
PB: predicated region body
PF: predicated region fallthrough
CT: control target
= control target key end

     0   :  { %12 = vsyncpa [#allocation3], 0  ;;  %s2313_s0 = inlined_call_operand.vmem [shape: f32[16,1536], index: 0, kind: input, shape index: {}]   ;;  %s2314_s1 = inlined_call_operand.hbm [shape: bf16[1536,128], index: 1, kind: input, shape index: {}]   ;;  %s2315_s2 = inlined_call_operand.vmem [shape: f32[1,128], index: 2, kind: input, shape index: {}]   ;;  %s2316_s3 = inlined_call_operand.vmem [shape: f32[1,128], index: 3, kind: input, shape index: {}]   ;;  %s2317_s4 = inlined_call_operand.vmem [shape: bf16[128,128], index: 4, kind: input, shape index: {}]   ;;  %s2318_s5 = inlined_call_operand.vmem [shape: f32[1,128], index: 5, kind: input, shape index: {}]   ;;  %s2319_s6 = inlined_call_operand.vmem [shape: f32[1,128], index: 6, kind: input, shape index: {}]   ;;  %s2320_s7 = inlined_call_operand.hbm [shape: f32[16,128], index: 7, kind: output, shape index: {}]  }
   0x1   :  { %13 = vsyncpa [#allocation4], 0 }
   0x2   :  { %15 = vsyncpa [#allocation4 + $0x1], 0  ;;  %s2158_s24 = smov 0   ;;  %s2160_s25 = smov 0  }
   0x3   :  { %s2162_s26 = smov 0   ;;  %s2164_s27 = smov 0  }
   0x4 LB: > { %s2179_s28 = sadd.s32 4294967295, %s2110_s27   ;;  %s1576_s29 = sadd.s32 4294967294, %s2110_s27   ;;  %s2110_s27 = sphi %s2164_s27, %s2328_s27   ;;  %s2106_s26 = sphi %s2162_s26, %s2327_s26   ;;  %s2102_s25 = sphi %s2160_s25, %s2326_s25   ;;  %s2098_s24 = sphi %s2158_s24, %s2325_s24  }
   0x5   : > { %s2183_s30 = sadd.s32 1, %s2110_s27   ;;  %s180_s8 = sadd.s32 1, %s2106_s26 }
   0x6   : > { %s177_s9 = ssub.s32 %s2110_s27, %s2183_s30  ;;  %p190_p0 = scmp.ne.s32.totalorder %s2106_s26, %s2102_s25 }
   0x7   : > { %p178_p1 = scmp.eq.s32.totalorder %s177_s9, 0  ;;  %p191_p2 = scmp.eq.s32.totalorder %s2179_s28, 1 }
   0x8   : > { %p196_p3 = scmp.ne.s32.totalorder %s2102_s25, %s2098_s24  ;;  %p197_p4 = scmp.eq.s32.totalorder %s1576_s29, 1 }
   0x9   : > { %s2194_s10 = scalar_select %p178_p1, %s2106_s26, %s180_s8  }
   0xa   : > { %p2196_p5 = por %p191_p2, %p190_p0  ;;  %p2200_p6 = por %p197_p4, %p196_p3 }
   0xb   : > { %p1577_p7 = scmp.ge.s32.totalorder %s2110_s27, 1  ;;  %p204_p8 = scmp.lt.s32.totalorder %s2110_s27, 3 }
   0xc   : > { %s2322_s12 = scalar_select %p2200_p6, 1, 0 }
   0xd   : > { %p1872_p9 = scmp.eq.s32.totalorder %s2179_s28, 0  ;;  %p2207_p10 = pnand %p1577_p7, %p204_p8 }
   0xe   : > { %s2112_s14 = smov [#allocation2]  }
   0xf   : > { %s216_s15 = sshll.u32 %s2112_s14, 4  ;;  %p1864_p11 = pneg %p2207_p10  ;;  %s217_s15 = int_to_ptr.vmem [resolvable:$true] %s216_s15 }
  0x10   : > { %s2031_s16 = scalar_lea.vmem %s217_s15, 12288  ;;  %p2039_p3 = scmp.lt.s32.totalorder %s217_s15, %s217_s15 }
  0x11   : > { %p1865_p12 = pnand %p1872_p9, %p1864_p11  ;;  %p2032_p0 = scmp.ne.s32.totalorder %s217_s15, %s2031_s16 }
  0x12   : > { %p2040_p4 = scmp.lt.s32.totalorder %s2031_s16, %s2031_s16 }
  0x13   : > { %p2022_p13 = pneg %p1865_p12 }
  0x14   : > { %p2041_p6 = por %p2040_p4, %p2039_p3 }
  0x15   : > { %p2034_p1 = pnand %p2032_p0, %p2022_p13 }
  0x17   : > { %p2035_p2 = pneg %p2034_p1 }
  0x19   : > { %p2042_p7 = pnand %p2041_p6, %p2035_p2 }
  0x1b   : > { %2045 = shalt.err (!%p2042_p7)
}
  0x1c   : > { %s2113_s17 = smov 64   ;;  %s2114_s18 = smov 4  }
  0x1d   : > { %1867 = dma.hbm_to_vmem [thread:$0]  (!%p1865_p12), %s2314_s1, 12288, %s217_s15, [#allocation3], %s2113_s17, %s2113_s17, %s2114_s18  }
  0x1e   : > { %255 = sbr.rel (%p2207_p10) target bundleno = 883 (0x373), region = 48 }
  0x23   : > { %2089 = dma.done.wait (%p1872_p9), [#allocation3], 12288  }
  0x24   : > { %2091 = vsyncadd (%p1872_p9), [#allocation3], 4294955008  ;;  %v1912_v0 = vld [vmem:[#allocation2 + $0x78] sm:$0xff]   ;;  %v1916_v4 = vld [vmem:[#allocation2 + $0x70] sm:$0xff]   ;;  %p287_p6 = scmp.lt.s32.totalorder %s2179_s28, 1  ;;  %vm2116_vm0 = vmmov 0  }
  0x25   : > { %v1913_v1 = vld [vmem:[#allocation2 + $0xf8] sm:$0xff]   ;;  %1696 = vmatprep.subr.bf16.mxu0 %v1912_v0  ;;  %v1917_v5 = vld [vmem:[#allocation2 + $0xf0] sm:$0xff]   ;;  %v1920_v8 = vld [vmem:[#allocation2 + $0x68] sm:$0xff]   ;;  %s284_s18 = sand.u32 1, %s2102_s25   ;;  %s1693_s29 = sshll.u32 %s2179_s28, 7 }
  0x26   : > { %v1914_v2 = vld [vmem:[#allocation2 + $0x38] sm:$0xff]   ;;  %1718 = vmatprep.subr.bf16.mxu1 %v1913_v1  ;;  %v1918_v6 = vld [vmem:[#allocation2 + $0x30] sm:$0xff]   ;;  %v1921_v9 = vld [vmem:[#allocation2 + $0xe8] sm:$0xff]   ;;  %s288_s21 = scalar_select %p287_p6, %s2179_s28, 1 }
  0x27   : > { %v1915_v3 = vld [vmem:[#allocation2 + $0xb8] sm:$0xff]   ;;  %1697 = vmatpush3.bf16.msra.mxu0 %v1914_v2  ;;  %v1919_v7 = vld [vmem:[#allocation2 + $0xb0] sm:$0xff]   ;;  %v1922_v10 = vld [vmem:[#allocation2 + $0x28] sm:$0xff]   ;;  %s1582_s19 = sshll.u32 %s284_s18, 3  ;;  %s1503_s15 = scalar_lea.hbm %s2320_s7, %s1693_s29 }
  0x28   : > { %1719 = vmatpush3.bf16.msra.mxu1 %v1915_v3  ;;  %1698 = vmatprep.subr.bf16.mxu0 %v1916_v4  ;;  %v1923_v11 = vld [vmem:[#allocation2 + $0xa8] sm:$0xff]   ;;  %v1924_v12 = vld [vmem:[#allocation2 + $0x60] sm:$0xff]   ;;  %v1928_v16 = vld [vmem:[#allocation2 + $0x58] sm:$0xff]   ;;  %s1857_s22 = smul.u32 96, %s288_s21  ;;  %s1492_s16 = scalar_lea.sflag [#allocation4], %s284_s18 }
  0x29   : > { %1720 = vmatprep.subr.bf16.mxu1 %v1917_v5  ;;  %v1925_v13 = vld [vmem:[#allocation2 + $0xe0] sm:$0xff]   ;;  %v1929_v17 = vld [vmem:[#allocation2 + $0xd8] sm:$0xff]   ;;  %v1932_v20 = vld [vmem:[#allocation2 + $0x50] sm:$0xff]   ;;  %s2117_s20 = smov [#allocation5]  }
  0x2a   : > { %v1926_v14 = vld [vmem:[#allocation2 + $0x20] sm:$0xff]   ;;  %v1930_v18 = vld [vmem:[#allocation2 + $0x18] sm:$0xff]   ;;  %v1933_v21 = vld [vmem:[#allocation2 + $0xd0] sm:$0xff]   ;;  %s2229_s8 = scalar_lea.vmem %s2313_s0, %s1857_s22  ;;  %s2050_s21 = sshll.u32 %s2117_s20, 4  ;;  %s2051_s21 = int_to_ptr.vmem [resolvable:$false] %s2050_s21 }
  0x2b   : > { %1699 = vmatpush3.bf16.msra.mxu0 %v1918_v6  ;;  %v1927_v15 = vld [vmem:[#allocation2 + $0xa0] sm:$0xff]   ;;  %v1931_v19 = vld [vmem:[#allocation2 + $0x98] sm:$0xff]   ;;  %v1934_v22 = vld [vmem:[#allocation2 + $0x10] sm:$0xff]   ;;  %s2052_s28 = scalar_lea.vmem %s2051_s21, 256 }
  0x2c   : > { %1721 = vmatpush3.bf16.msra.mxu1 %v1919_v7  ;;  %1700 = vmatprep.subr.bf16.mxu0 %v1920_v8  ;;  %v1935_v23 = vld [vmem:[#allocation2 + $0x90] sm:$0xff]   ;;  %v1936_v24 = vld [vmem:[#allocation2 + $0x48] sm:$0xff]   ;;  %v1940_v28 = vld [vmem:[#allocation2 + $0x40] sm:$0xff]  }
  0x2d   : > { %1722 = vmatprep.subr.bf16.mxu1 %v1921_v9  ;;  %v1937_v25 = vld [vmem:[#allocation2 + $0xc8] sm:$0xff]   ;;  %v1941_v29 = vld [vmem:[#allocation2 + $0xc0] sm:$0xff]   ;;  %v296_v33 = vld [vmem:[%s2229_s8 + $0x18] sm:$0xff] }
  0x2e   : > { %v1938_v26 = vld [vmem:[#allocation2 + $0x8] sm:$0xff]   ;;  %v1942_v30 = vld [vmem:[#allocation2] sm:$0xff]   ;;  %v308_v36 = vpack.c.bf16 %v296_v33, %v296_v33  ;;  %v295_v38 = vld [vmem:[%s2229_s8 + $0x10] sm:$0xff] }
  0x2f   : > { %1701 = vmatpush3.bf16.msra.mxu0 %v1922_v10  ;;  %v1939_v27 = vld [vmem:[#allocation2 + $0x88] sm:$0xff]   ;;  %v1943_v31 = vld [vmem:[#allocation2 + $0x80] sm:$0xff]   ;;  %v307_v39 = vpack.c.bf16 %v295_v38, %v295_v38  ;;  %v1944_v40 = vld [vmem:[#allocation2 + $0x178] sm:$0xff]  }
  0x30   : > { %1723 = vmatpush3.bf16.msra.mxu1 %v1923_v11  ;;  %1702 = vmatprep.subr.bf16.mxu0 %v1924_v12  ;;  %v294_v32 = vld [vmem:[%s2229_s8 + $0x8] sm:$0xff]  ;;  %v293_v34 = vld [vmem:[%s2229_s8] sm:$0xff]  ;;  %v1945_v41 = vld [vmem:[#allocation2 + $0x1f8] sm:$0xff]  }
  0x31   : > { %1724 = vmatprep.subr.bf16.mxu1 %v1925_v13  ;;  %v306_v35 = vpack.c.bf16 %v294_v32, %v294_v32  ;;  %v305_v37 = vpack.c.bf16 %v293_v34, %v293_v34  ;;  %1157 = vmatprep.mubr.bf16.mxu1 %v308_v36  ;;  %v1946_v42 = vld [vmem:[#allocation2 + $0x138] sm:$0xff]   ;;  %v1948_v44 = vld [vmem:[#allocation2 + $0x170] sm:$0xff]   ;;  %v1952_v48 = vld [vmem:[#allocation2 + $0x168] sm:$0xff]  }
  0x32   : > { %v1947_v43 = vld [vmem:[#allocation2 + $0x1b8] sm:$0xff]   ;;  %v1949_v45 = vld [vmem:[#allocation2 + $0x1f0] sm:$0xff]   ;;  %v1953_v49 = vld [vmem:[#allocation2 + $0x1e8] sm:$0xff]  }
  0x33   : > { %1703 = vmatpush3.bf16.msra.mxu0 %v1926_v14  ;;  %1117 = vmatprep.mubr.bf16.mxu0 %v306_v35  ;;  %v1950_v46 = vld [vmem:[#allocation2 + $0x130] sm:$0xff]   ;;  %v1954_v50 = vld [vmem:[#allocation2 + $0x128] sm:$0xff]   ;;  %v1956_v52 = vld [vmem:[#allocation2 + $0x160] sm:$0xff]  }
  0x34   : > { %1725 = vmatpush3.bf16.msra.mxu1 %v1927_v15  ;;  %1704 = vmatprep.subr.bf16.mxu0 %v1928_v16  ;;  %v1951_v47 = vld [vmem:[#allocation2 + $0x1b0] sm:$0xff]   ;;  %v1955_v51 = vld [vmem:[#allocation2 + $0x1a8] sm:$0xff]   ;;  %v1957_v53 = vld [vmem:[#allocation2 + $0x1e0] sm:$0xff]  }
  0x35   : > { %1726 = vmatprep.subr.bf16.mxu1 %v1929_v17  ;;  %v1958_v54 = vld [vmem:[#allocation2 + $0x120] sm:$0xff]   ;;  %v1960_v56 = vld [vmem:[#allocation2 + $0x158] sm:$0xff]   ;;  %v1964_v60 = vld [vmem:[#allocation2 + $0x150] sm:$0xff]  }
  0x36   : > { %v1959_v55 = vld [vmem:[#allocation2 + $0x1a0] sm:$0xff]   ;;  %v1961_v57 = vld [vmem:[#allocation2 + $0x1d8] sm:$0xff]   ;;  %v1965_v61 = vld [vmem:[#allocation2 + $0x1d0] sm:$0xff]  }
  0x37   : > { %1705 = vmatpush3.bf16.msra.mxu0 %v1930_v18  ;;  %v1962_v58 = vld [vmem:[#allocation2 + $0x118] sm:$0xff]   ;;  %v1966_v62 = vld [vmem:[#allocation2 + $0x110] sm:$0xff]   ;;  %v1968_v0 = vld [vmem:[#allocation2 + $0x148] sm:$0xff]  }
  0x38   : > { %1727 = vmatpush3.bf16.msra.mxu1 %v1931_v19  ;;  %1706 = vmatprep.subr.bf16.mxu0 %v1932_v20  ;;  %v1963_v59 = vld [vmem:[#allocation2 + $0x198] sm:$0xff]   ;;  %v1967_v63 = vld [vmem:[#allocation2 + $0x190] sm:$0xff]   ;;  %v1969_v1 = vld [vmem:[#allocation2 + $0x1c8] sm:$0xff]  }
  0x39   : > { %1728 = vmatprep.subr.bf16.mxu1 %v1933_v21  ;;  %v1970_v2 = vld [vmem:[#allocation2 + $0x108] sm:$0xff]   ;;  %v1972_v4 = vld [vmem:[#allocation2 + $0x140] sm:$0xff]   ;;  %v300_v9 = vld [vmem:[%s2229_s8 + $0x38] sm:$0xff] }
  0x3a   : > { %v1971_v3 = vld [vmem:[#allocation2 + $0x188] sm:$0xff]   ;;  %v1973_v5 = vld [vmem:[#allocation2 + $0x1c0] sm:$0xff]   ;;  %v312_v11 = vpack.c.bf16 %v300_v9, %v300_v9  ;;  %v299_v13 = vld [vmem:[%s2229_s8 + $0x30] sm:$0xff] }
  0x3b   : > { %1707 = vmatpush3.bf16.msra.mxu0 %v1934_v22  ;;  %v1974_v6 = vld [vmem:[#allocation2 + $0x100] sm:$0xff]   ;;  %v298_v8 = vld [vmem:[%s2229_s8 + $0x28] sm:$0xff]  ;;  %v311_v15 = vpack.c.bf16 %v299_v13, %v299_v13  ;;  %v1976_v16 = vld [vmem:[#allocation2 + $0x278] sm:$0xff]  }
  0x3c   : > { %1729 = vmatpush3.bf16.msra.mxu1 %v1935_v23  ;;  %1708 = vmatprep.subr.bf16.mxu0 %v1936_v24  ;;  %v1975_v7 = vld [vmem:[#allocation2 + $0x180] sm:$0xff]   ;;  %v310_v10 = vpack.c.bf16 %v298_v8, %v298_v8  ;;  %v1977_v17 = vld [vmem:[#allocation2 + $0x2f8] sm:$0xff]   ;;  %v1980_v20 = vld [vmem:[#allocation2 + $0x270] sm:$0xff]  }
  0x3d   : > { %1730 = vmatprep.subr.bf16.mxu1 %v1937_v25  ;;  %v297_v12 = vld [vmem:[%s2229_s8 + $0x20] sm:$0xff]  ;;  %v1978_v18 = vld [vmem:[#allocation2 + $0x238] sm:$0xff]   ;;  %v1981_v21 = vld [vmem:[#allocation2 + $0x2f0] sm:$0xff]  }
  0x3e   : > { %v309_v14 = vpack.c.bf16 %v297_v12, %v297_v12  ;;  %v1979_v19 = vld [vmem:[#allocation2 + $0x2b8] sm:$0xff]   ;;  %v1982_v22 = vld [vmem:[#allocation2 + $0x230] sm:$0xff]   ;;  %v1984_v24 = vld [vmem:[#allocation2 + $0x268] sm:$0xff]  }
  0x3f   : > { %1709 = vmatpush3.bf16.msra.mxu0 %v1938_v26  ;;  %v1983_v23 = vld [vmem:[#allocation2 + $0x2b0] sm:$0xff]   ;;  %v1985_v25 = vld [vmem:[#allocation2 + $0x2e8] sm:$0xff]   ;;  %v1992_v32 = vld [vmem:[#allocation2 + $0x258] sm:$0xff]  }
  0x40   : > { %1731 = vmatpush3.bf16.msra.mxu1 %v1939_v27  ;;  %1710 = vmatprep.subr.bf16.mxu0 %v1940_v28  ;;  %v1986_v26 = vld [vmem:[#allocation2 + $0x228] sm:$0xff]   ;;  %v1988_v28 = vld [vmem:[#allocation2 + $0x260] sm:$0xff]   ;;  %v1993_v33 = vld [vmem:[#allocation2 + $0x2d8] sm:$0xff]  }
  0x41   : > { %1732 = vmatprep.subr.bf16.mxu1 %v1941_v29  ;;  %v1987_v27 = vld [vmem:[#allocation2 + $0x2a8] sm:$0xff]   ;;  %v1989_v29 = vld [vmem:[#allocation2 + $0x2e0] sm:$0xff]   ;;  %v1994_v34 = vld [vmem:[#allocation2 + $0x218] sm:$0xff]  }
  0x42   : > { %v1995_v35 = vld [vmem:[#allocation2 + $0x298] sm:$0xff]   ;;  %v1996_v36 = vld [vmem:[#allocation2 + $0x250] sm:$0xff]  }
  0x43   : > { %1711 = vmatpush3.bf16.msra.mxu0 %v1942_v30  ;;  %v1990_v30 = vld [vmem:[#allocation2 + $0x220] sm:$0xff]   ;;  %v1998_v38 = vld [vmem:[#allocation2 + $0x210] sm:$0xff]  }
  0x44   : > { %1733 = vmatpush3.bf16.msra.mxu1 %v1943_v31  ;;  %1740 = vmatprep.subr.bf16.mxu0 %v1944_v40  ;;  %v1991_v31 = vld [vmem:[#allocation2 + $0x2a0] sm:$0xff]   ;;  %v2000_v40 = vld [vmem:[#allocation2 + $0x248] sm:$0xff]  }
  0x45   : > { %1762 = vmatprep.subr.bf16.mxu1 %v1945_v41  ;;  %v2001_v41 = vld [vmem:[#allocation2 + $0x2c8] sm:$0xff]  }
  0x46   : > { %1118 = vmatmul.mubr.bf16.vlgmr.msra.gmra.mxu0 %v305_v37  ;;  %v1997_v37 = vld [vmem:[#allocation2 + $0x2d0] sm:$0xff]  }
  0x47   : > { %1158 = vmatmul.mubr.bf16.vlgmr.msra.gmra.mxu1 %v307_v39  ;;  %1741 = vmatpush3.bf16.msra.mxu0 %v1946_v42  ;;  %v1999_v39 = vld [vmem:[#allocation2 + $0x290] sm:$0xff]   ;;  %v2002_v42 = vld [vmem:[#allocation2 + $0x208] sm:$0xff]  }
  0x48   : > { %1763 = vmatpush3.bf16.msra.mxu1 %v1947_v43  ;;  %1742 = vmatprep.subr.bf16.mxu0 %v1948_v44  ;;  %v2003_v43 = vld [vmem:[#allocation2 + $0x288] sm:$0xff]   ;;  %v2004_v44 = vld [vmem:[#allocation2 + $0x240] sm:$0xff]  }
  0x49   : > { %1764 = vmatprep.subr.bf16.mxu1 %v1949_v45  ;;  %1197 = vmatprep.mubr.bf16.mxu0 %v310_v10  ;;  %v2005_v45 = vld [vmem:[#allocation2 + $0x2c0] sm:$0xff]  }
  0x4a   : > { %1237 = vmatprep.mubr.bf16.mxu1 %v312_v11 }
  0x4b   : > { %1743 = vmatpush3.bf16.msra.mxu0 %v1950_v46  ;;  %v2006_v46 = vld [vmem:[#allocation2 + $0x200] sm:$0xff]  }
  0x4c   : > { %1765 = vmatpush3.bf16.msra.mxu1 %v1951_v47  ;;  %1744 = vmatprep.subr.bf16.mxu0 %v1952_v48  ;;  %v2007_v47 = vld [vmem:[#allocation2 + $0x280] sm:$0xff]   ;;  %v302_v48 = vld [vmem:[%s2229_s8 + $0x48] sm:$0xff] }
  0x4d   : > { %1766 = vmatprep.subr.bf16.mxu1 %v1953_v49  ;;  %v314_v49 = vpack.c.bf16 %v302_v48, %v302_v48  ;;  %v1681_v48 = vld [vmem:[%s2316_s3] ss:$0 sm:$0xff] }
  0x4f   : > { %1745 = vmatpush3.bf16.msra.mxu0 %v1954_v50  ;;  %v304_v50 = vld [vmem:[%s2229_s8 + $0x58] sm:$0xff] }
  0x50   : > { %1767 = vmatpush3.bf16.msra.mxu1 %v1955_v51  ;;  %1746 = vmatprep.subr.bf16.mxu0 %v1956_v52  ;;  %v301_v51 = vld [vmem:[%s2229_s8 + $0x40] sm:$0xff]  ;;  %v303_v52 = vld [vmem:[%s2229_s8 + $0x50] sm:$0xff]  ;;  %s286_s8 = scalar_lea.vmem [#allocation5], %s1582_s19 }
  0x51   : > { %1768 = vmatprep.subr.bf16.mxu1 %v1957_v53  ;;  %v316_v53 = vpack.c.bf16 %v304_v50, %v304_v50  ;;  %s1505_s9 = sshll.u32 %s286_s8, 4  ;;  %s1506_s9 = int_to_ptr.vmem [resolvable:$true] %s1505_s9 }
  0x52   : > { %s2046_s17 = scalar_lea.vmem %s1506_s9, 128  ;;  %p2053_p11 = scmp.lt.s32.totalorder %s1506_s9, %s2051_s21 }
  0x53   : > { %1747 = vmatpush3.bf16.msra.mxu0 %v1958_v54  ;;  %v313_v54 = vpack.c.bf16 %v301_v51, %v301_v51  ;;  %p2047_p8 = scmp.ne.s32.totalorder %s1506_s9, %s2046_s17  ;;  %p2054_p12 = scmp.lt.s32.totalorder %s2052_s28, %s2046_s17 }
  0x54   : > { %1769 = vmatpush3.bf16.msra.mxu1 %v1959_v55  ;;  %1748 = vmatprep.subr.bf16.mxu0 %v1960_v56  ;;  %v315_v55 = vpack.c.bf16 %v303_v52, %v303_v52 }
  0x55   : > { %1770 = vmatprep.subr.bf16.mxu1 %v1961_v57  ;;  %p2048_p9 = pnand %p2047_p8, %p2196_p5  ;;  %p2055_p13 = por %p2054_p12, %p2053_p11 }
  0x57   : > { %1749 = vmatpush3.bf16.msra.mxu0 %v1962_v58  ;;  %p2049_p10 = pneg %p2048_p9 }
  0x58   : > { %1771 = vmatpush3.bf16.msra.mxu1 %v1963_v59  ;;  %1750 = vmatprep.subr.bf16.mxu0 %v1964_v60 }
  0x59   : > { %1772 = vmatprep.subr.bf16.mxu1 %v1965_v61  ;;  %p2056_p0 = pnand %p2055_p13, %p2049_p10 }
  0x5b   : > { %1751 = vmatpush3.bf16.msra.mxu0 %v1966_v62 }
  0x5c   : > { %1773 = vmatpush3.bf16.msra.mxu1 %v1967_v63  ;;  %1752 = vmatprep.subr.bf16.mxu0 %v1968_v0 }
  0x5d   : > { %1774 = vmatprep.subr.bf16.mxu1 %v1969_v1 }
  0x5f   : > { %1753 = vmatpush3.bf16.msra.mxu0 %v1970_v2 }
  0x60   : > { %1775 = vmatpush3.bf16.msra.mxu1 %v1971_v3  ;;  %1754 = vmatprep.subr.bf16.mxu0 %v1972_v4 }
  0x61   : > { %1776 = vmatprep.subr.bf16.mxu1 %v1973_v5 }
  0x63   : > { %1755 = vmatpush3.bf16.msra.mxu0 %v1974_v6 }
  0x64   : > { %1777 = vmatpush3.bf16.msra.mxu1 %v1975_v7  ;;  %1784 = vmatprep.subr.bf16.mxu0 %v1976_v16 }
  0x65   : > { %1806 = vmatprep.subr.bf16.mxu1 %v1977_v17 }
  0x66   : > { %1198 = vmatmul.mubr.bf16.vlgmr.msra.gmra.mxu0 %v309_v14 }
  0x67   : > { %1238 = vmatmul.mubr.bf16.vlgmr.msra.gmra.mxu1 %v311_v15  ;;  %1785 = vmatpush3.bf16.msra.mxu0 %v1978_v18 }
  0x68   : > { %1807 = vmatpush3.bf16.msra.mxu1 %v1979_v19  ;;  %1786 = vmatprep.subr.bf16.mxu0 %v1980_v20 }
  0x69   : > { %1808 = vmatprep.subr.bf16.mxu1 %v1981_v21  ;;  %1277 = vmatprep.mubr.bf16.mxu0 %v314_v49 }
  0x6a   : > { %1317 = vmatprep.mubr.bf16.mxu1 %v316_v53 }
  0x6b   : > { %1787 = vmatpush3.bf16.msra.mxu0 %v1982_v22 }
  0x6c   : > { %1809 = vmatpush3.bf16.msra.mxu1 %v1983_v23  ;;  %1788 = vmatprep.subr.bf16.mxu0 %v1984_v24 }
  0x6d   : > { %1810 = vmatprep.subr.bf16.mxu1 %v1985_v25 }
  0x6f   : > { %1789 = vmatpush3.bf16.msra.mxu0 %v1986_v26 }
  0x70   : > { %1811 = vmatpush3.bf16.msra.mxu1 %v1987_v27  ;;  %1790 = vmatprep.subr.bf16.mxu0 %v1988_v28  ;;  %v2008_v28 = vld [vmem:[%s2317_s4 + $0x38] sm:$0xff]  }
  0x71   : > { %1812 = vmatprep.subr.bf16.mxu1 %v1989_v29  ;;  %v2115_v29 = vmov 0.0  }
  0x73   : > { %1791 = vmatpush3.bf16.msra.mxu0 %v1990_v30  ;;  %v2009_v30 = vld [vmem:[%s2317_s4 + $0x30] sm:$0xff]  }
  0x74   : > { %1813 = vmatpush3.bf16.msra.mxu1 %v1991_v31  ;;  %1792 = vmatprep.subr.bf16.mxu0 %v1992_v32  ;;  %v2010_v31 = vld [vmem:[%s2317_s4 + $0x28] sm:$0xff]   ;;  %v2011_v32 = vld [vmem:[%s2317_s4 + $0x20] sm:$0xff]  }
  0x75   : > { %1814 = vmatprep.subr.bf16.mxu1 %v1993_v33  ;;  %v2012_v33 = vld [vmem:[%s2317_s4 + $0x18] sm:$0xff]  }
  0x77   : > { %1793 = vmatpush3.bf16.msra.mxu0 %v1994_v34  ;;  %v2013_v34 = vld [vmem:[%s2317_s4 + $0x10] sm:$0xff]  }
  0x78   : > { %1815 = vmatpush3.bf16.msra.mxu1 %v1995_v35  ;;  %1794 = vmatprep.subr.bf16.mxu0 %v1996_v36  ;;  %v2014_v35 = vld [vmem:[%s2317_s4 + $0x8] sm:$0xff]   ;;  %v2015_v36 = vld [vmem:[%s2317_s4] sm:$0xff]  }
  0x79   : > { %1816 = vmatprep.subr.bf16.mxu1 %v1997_v37 }
  0x7b   : > { %1795 = vmatpush3.bf16.msra.mxu0 %v1998_v38 }
  0x7c   : > { %1817 = vmatpush3.bf16.msra.mxu1 %v1999_v39  ;;  %1796 = vmatprep.subr.bf16.mxu0 %v2000_v40 }
  0x7d   : > { %1818 = vmatprep.subr.bf16.mxu1 %v2001_v41 }
  0x7f   : > { %1797 = vmatpush3.bf16.msra.mxu0 %v2002_v42 }
  0x80   : > { %1819 = vmatpush3.bf16.msra.mxu1 %v2003_v43  ;;  %1798 = vmatprep.subr.bf16.mxu0 %v2004_v44 }
  0x81   : > { %1820 = vmatprep.subr.bf16.mxu1 %v2005_v45 }
  0x83   : > { %1799 = vmatpush3.bf16.msra.mxu0 %v2006_v46  ;;  %v1680_v46 = vld [vmem:[%s2315_s2] ss:$0 sm:$0xff] }
  0x84   : > { %1821 = vmatpush3.bf16.msra.mxu1 %v2007_v47  ;;  %1837 = vmatprep.subr.bf16.mxu0 %v2115_v29 }
  0x86   : > { %1278 = vmatmul.mubr.bf16.vlgmr.msra.gmra.mxu0 %v313_v54 }
  0x87   : > { %1318 = vmatmul.mubr.bf16.vlgmr.msra.gmra.mxu1 %v315_v55  ;;  %1838 = vmatpush3.bf16.msra.mxu0 %v2008_v28 }
  0x88   : > { %1839 = vmatprep.subr.bf16.mxu0 %v2115_v29  ;;  %1853 = vmatprep.mubr.msk.bf16.mxu0 %vm2116_vm0, %v2115_v29 }
  0x8b   : > { %1840 = vmatpush3.bf16.msra.mxu0 %v2009_v30 }
  0x8c   : > { %1841 = vmatprep.subr.bf16.mxu0 %v2115_v29 }
  0x8f   : > { %1842 = vmatpush3.bf16.msra.mxu0 %v2010_v31 }
  0x90   : > { %1843 = vmatprep.subr.bf16.mxu0 %v2115_v29 }
  0x93   : > { %1844 = vmatpush3.bf16.msra.mxu0 %v2011_v32 }
  0x94   : > { %1845 = vmatprep.subr.bf16.mxu0 %v2115_v29 }
  0x97   : > { %1846 = vmatpush3.bf16.msra.mxu0 %v2012_v33 }
  0x98   : > { %1847 = vmatprep.subr.bf16.mxu0 %v2115_v29 }
  0x9b   : > { %1848 = vmatpush3.bf16.msra.mxu0 %v2013_v34 }
  0x9c   : > { %1849 = vmatprep.subr.bf16.mxu0 %v2115_v29 }
  0x9f   : > { %1850 = vmatpush3.bf16.msra.mxu0 %v2014_v35 }
  0xa0   : > { %1851 = vmatprep.subr.bf16.mxu0 %v2115_v29 }
  0xa3   : > { %1852 = vmatpush3.bf16.msra.mxu0 %v2015_v36 }
 0x106   : > { %v1712_v56 = vpop.f32.mrf.mxu0 }
 0x107   : > { %v1734_v57 = vpop.f32.mrf.mxu1 }
 0x108   : > { %v1713_v58 = vpop.f32.mrf.mxu0 }
 0x109   : > { %v1735_v59 = vpop.f32.mrf.mxu1  ;;  %v1714_v8 = vadd.f32 %v1713_v58, %v1712_v56 }
 0x10a   : > { %v1715_v60 = vpop.f32.mrf.mxu0  ;;  %v1736_v9 = vadd.f32 %v1735_v59, %v1734_v57 }
 0x10b   : > { %v1737_v61 = vpop.f32.mrf.mxu1 }
 0x10c   : > { %v1716_v62 = vpop.f32.mrf.mxu0  ;;  %v1160_v11 = vadd.f32 %v1736_v9, %v1714_v8 }
 0x10d   : > { %v1738_v63 = vpop.f32.mrf.mxu1 }
 0x126   : > { %v1756_v0 = vpop.f32.mrf.mxu0 }
 0x127   : > { %v1778_v1 = vpop.f32.mrf.mxu1 }
 0x128   : > { %v1757_v2 = vpop.f32.mrf.mxu0 }
 0x129   : > { %v1779_v3 = vpop.f32.mrf.mxu1  ;;  %v1758_v10 = vadd.f32 %v1757_v2, %v1756_v0 }
 0x12a   : > { %v1759_v4 = vpop.f32.mrf.mxu0  ;;  %v1780_v13 = vadd.f32 %v1779_v3, %v1778_v1  ;;  %v1690_v3 = vld [vmem:[%s2318_s5] ss:$0 sm:$0xff] }
 0x12b   : > { %v1781_v5 = vpop.f32.mrf.mxu1  ;;  %v1200_v12 = vadd.f32 %v1758_v10, %v1160_v11 }
 0x12c   : > { %v1760_v6 = vpop.f32.mrf.mxu0  ;;  %v1691_v5 = vld [vmem:[%s2319_s6] ss:$0 sm:$0xff] }
 0x12d   : > { %v1782_v7 = vpop.f32.mrf.mxu1  ;;  %v1240_v17 = vadd.f32 %v1780_v13, %v1200_v12 }
 0x146   : > { %v1800_v14 = vpop.f32.mrf.mxu0 }
 0x147   : > { %v1822_v15 = vpop.f32.mrf.mxu1 }
 0x148   : > { %v1801_v16 = vpop.f32.mrf.mxu0 }
 0x149   : > { %v1802_v18 = vadd.f32 %v1801_v16, %v1800_v14  ;;  %v1823_v19 = vpop.f32.mrf.mxu1 }
 0x14a   : > { %v1803_v20 = vpop.f32.mrf.mxu0  ;;  %v1824_v22 = vadd.f32 %v1823_v19, %v1822_v15 }
 0x14b   : > { %v1280_v21 = vadd.f32 %v1802_v18, %v1240_v17  ;;  %v1825_v23 = vpop.f32.mrf.mxu1 }
 0x14c   : > { %v1804_v24 = vpop.f32.mrf.mxu0 }
 0x14d   : > { %v1320_v25 = vadd.f32 %v1824_v22, %v1280_v21  ;;  %v1826_v26 = vpop.f32.mrf.mxu1 }
 0x14f   : > { %1327 = vadd.xlane.f32.xlu0 %v1320_v25  ;;  %v1330_v27 = vmul.f32 %v1320_v25, %v1320_v25 }
 0x153   : > { %1331 = vadd.xlane.f32.xlu0 %v1330_v27 }
 0x1d8   : > { %v1328_v37 = vpop.xlane.xlu0 %1327 }
 0x1d9   : > { %v1329_v38 = vmul.f32 0.02, %v1328_v37 }
 0x1db   : > { %v1334_v40 = vmul.f32 %v1329_v38, %v1329_v38  ;;  %v1336_v44 = vsub.f32 %v1320_v25, %v1329_v38 }
 0x1dc   : > { %v1332_v39 = vpop.xlane.xlu0 %1331 }
 0x1dd   : > { %v1333_v41 = vmul.f32 0.02, %v1332_v39 }
 0x1df   : > { %v1335_v42 = vsub.f32 %v1333_v41, %v1334_v40 }
 0x1e1   : > { %v1337_v43 = vadd.f32 1e-05, %v1335_v42 }
 0x1e3   : > { %2016 = vrsqrt.f32 %v1337_v43 }
 0x1f0   : > { %v2017_v45 = vpop.eup %2016 }
 0x1f1   : > { %v1339_v47 = vmul.f32 %v2017_v45, %v1336_v44 }
 0x1f3   : > { %v1346_v49 = vmul.f32 %v1680_v46, %v1339_v47 }
 0x1f5   : > { %v1353_v50 = vadd.f32 %v1681_v48, %v1346_v49 }
 0x1f7   : > { %v1354_v51 = vmax.f32 %v1353_v50, 0.0 }
 0x1f9   : > { %v1355_v52 = vpack.c.bf16 %v1354_v51, %v1354_v51 }
 0x1fb   : > { %1854 = vmatmul.mubr.bf16.vlgmr.msra.gmra.mxu0 %v1355_v52 }
 0x2bb   : > { %v1454_v53 = vpop.f32.mrf.mxu0 }
 0x2bc   : > { %1462 = vadd.xlane.f32.xlu1 %v1454_v53  ;;  %v1465_v55 = vmul.f32 %v1454_v53, %v1454_v53 }
 0x2bd   : > { %v1855_v54 = vpop.f32.mrf.mxu0 }
 0x2bf   : > { %v1457_v56 = vpop.f32.mrf.mxu0 }
 0x2c0   : > { %1466 = vadd.xlane.f32.xlu1 %v1465_v55 }
 0x2c1   : > { %v1856_v57 = vpop.f32.mrf.mxu0 }
 0x345   : > { %v1463_v58 = vpop.xlane.xlu1 %1462 }
 0x346   : > { %v1464_v59 = vmul.f32 0.02, %v1463_v58 }
 0x348   : > { %v1469_v61 = vmul.f32 %v1464_v59, %v1464_v59  ;;  %v1471_v1 = vsub.f32 %v1454_v53, %v1464_v59 }
 0x349   : > { %v1467_v60 = vpop.xlane.xlu1 %1466 }
 0x34a   : > { %v1468_v62 = vmul.f32 0.02, %v1467_v60 }
 0x34c   : > { %v1470_v63 = vsub.f32 %v1468_v62, %v1469_v61 }
 0x34e   : > { %v1472_v0 = vadd.f32 1e-05, %v1470_v63 }
 0x350   : > { %2018 = vrsqrt.f32 %v1472_v0 }
 0x35d   : > { %v2019_v2 = vpop.eup %2018 }
 0x35e   : > { %v1474_v4 = vmul.f32 %v2019_v2, %v1471_v1 }
 0x360   : > { %v1481_v6 = vmul.f32 %v1690_v3, %v1474_v4 }
 0x362   : > { %v1488_v7 = vadd.f32 %v1691_v5, %v1481_v6 }
 0x364   : > { %v1489_v8 = vmax.f32 %v1488_v7, 0.0 }
 0x366   : > { %1490 = vst [vmem:[%s286_s8] sm:$0xff] %v1489_v8 }
 0x367   : > { %2059 = shalt.err (!%p2056_p0)
}
 0x368   : > { %s2060_s19 = scalar_lea.hbm %s1503_s15, 128  ;;  %s2064_s23 = scalar_lea.hbm %s2320_s7, 256 }
 0x369   : > { %p2061_p1 = scmp.ne.s32.totalorder %s1503_s15, %s2060_s19  ;;  %p2065_p4 = scmp.lt.s32.totalorder %s1503_s15, %s2320_s7 }
 0x36a   : > { %p2066_p7 = scmp.lt.s32.totalorder %s2064_s23, %s2060_s19 }
 0x36b   : > { %p2062_p2 = pnand %p2061_p1, %p2196_p5 }
 0x36c   : > { %p2067_p6 = por %p2066_p7, %p2065_p4 }
 0x36d   : > { %p2063_p3 = pneg %p2062_p2 }
 0x36f   : > { %p2068_p8 = pnand %p2067_p6, %p2063_p3 }
 0x371   : > { %2071 = shalt.err (!%p2068_p8)
}
 0x372   : > { %1862 = dma.vmem_to_hbm [thread:$0]  (%p2196_p5), %s1506_s9, 128, %s1503_s15, %s1492_s16  }
 0x373 PF: > { %p1874_p9 = scmp.ge.s32.totalorder %s2110_s27, 2  ;;  %s1517_s13 = sand.u32 1, %s2098_s24  }
 0x374   : > { %p2324_p10 = scmp.ne.s32.totalorder %s2322_s12, 0  ;;  %s1518_s14 = scalar_lea.sflag [#allocation4], %s1517_s13 }
 0x376   : > { %p1869_p11 = pnand %p1874_p9, %p2324_p10 }
 0x378   : > { %p1870_p12 = pneg %p1869_p11 }
 0x37a   : > { %2093 = dma.done.wait (%p1870_p12), %s1518_s14, 128  }
 0x37b   : > { %2095 = vsyncadd (%p1870_p12), %s1518_s14, 4294967168  ;;  %p18_p13 = scmp.ge.s32.totalorder %s2183_s30, 4   ;;  %s2325_s24 = smov %s2102_s25 }
 0x37c   : > { %s2326_s25 = smov %s2106_s26  ;;  %s2327_s26 = smov %s2194_s10 }
 0x37d   : > { %s2328_s27 = smov %s2183_s30  ;;  %20 = sbr.rel (!%p18_p13) target bundleno = 4 (0x4), region = 88 }
 0x382   :  { %1523 = vsyncpa [#allocation3], 1 }
 0x383   :  { %1525 = vsyncpa [#allocation3 + $0x1], 1 }
 0x384   :  { %1526 = vsyncpa [#allocation4], 1 }
 0x385   :  { %1528 = vsyncpa [#allocation4 + $0x1], 1 }

// kernel: simple_projection_head.1
= control target key start
LH: loop header
LB: loop body
LE: loop exit
PB: predicated region body
PF: predicated region fallthrough
CT: control target
= control target key end

     0   :  { %12 = vsyncpa [#allocation3], 0  ;;  %s2313_s0 = inlined_call_operand.vmem [shape: f32[16,1536], index: 0, kind: input, shape index: {}]   ;;  %s2314_s1 = inlined_call_operand.hbm [shape: bf16[1536,128], index: 1, kind: input, shape index: {}]   ;;  %s2315_s2 = inlined_call_operand.vmem [shape: f32[1,128], index: 2, kind: input, shape index: {}]   ;;  %s2316_s3 = inlined_call_operand.vmem [shape: f32[1,128], index: 3, kind: input, shape index: {}]   ;;  %s2317_s4 = inlined_call_operand.vmem [shape: bf16[128,128], index: 4, kind: input, shape index: {}]   ;;  %s2318_s5 = inlined_call_operand.vmem [shape: f32[1,128], index: 5, kind: input, shape index: {}]   ;;  %s2319_s6 = inlined_call_operand.vmem [shape: f32[1,128], index: 6, kind: input, shape index: {}]   ;;  %s2320_s7 = inlined_call_operand.hbm [shape: f32[16,128], index: 7, kind: output, shape index: {}]  }
   0x1   :  { %13 = vsyncpa [#allocation4], 0 }
   0x2   :  { %15 = vsyncpa [#allocation4 + $0x1], 0  ;;  %s2158_s24 = smov 0   ;;  %s2160_s25 = smov 0  }
   0x3   :  { %s2162_s26 = smov 0   ;;  %s2164_s27 = smov 0  }
   0x4 LB: > { %s2179_s28 = sadd.s32 4294967295, %s2110_s27   ;;  %s1576_s29 = sadd.s32 4294967294, %s2110_s27   ;;  %s2110_s27 = sphi %s2164_s27, %s2328_s27   ;;  %s2106_s26 = sphi %s2162_s26, %s2327_s26   ;;  %s2102_s25 = sphi %s2160_s25, %s2326_s25   ;;  %s2098_s24 = sphi %s2158_s24, %s2325_s24  }
   0x5   : > { %s2183_s30 = sadd.s32 1, %s2110_s27   ;;  %s180_s8 = sadd.s32 1, %s2106_s26 }
   0x6   : > { %s177_s9 = ssub.s32 %s2110_s27, %s2183_s30  ;;  %p190_p0 = scmp.ne.s32.totalorder %s2106_s26, %s2102_s25 }
   0x7   : > { %p178_p1 = scmp.eq.s32.totalorder %s177_s9, 0  ;;  %p191_p2 = scmp.eq.s32.totalorder %s2179_s28, 1 }
   0x8   : > { %p196_p3 = scmp.ne.s32.totalorder %s2102_s25, %s2098_s24  ;;  %p197_p4 = scmp.eq.s32.totalorder %s1576_s29, 1 }
   0x9   : > { %s2194_s10 = scalar_select %p178_p1, %s2106_s26, %s180_s8  }
   0xa   : > { %p2196_p5 = por %p191_p2, %p190_p0  ;;  %p2200_p6 = por %p197_p4, %p196_p3 }
   0xb   : > { %p1577_p7 = scmp.ge.s32.totalorder %s2110_s27, 1  ;;  %p204_p8 = scmp.lt.s32.totalorder %s2110_s27, 3 }
   0xc   : > { %s2322_s12 = scalar_select %p2200_p6, 1, 0 }
   0xd   : > { %p1872_p9 = scmp.eq.s32.totalorder %s2179_s28, 0  ;;  %p2207_p10 = pnand %p1577_p7, %p204_p8 }
   0xe   : > { %s2112_s14 = smov [#allocation2]  }
   0xf   : > { %s216_s15 = sshll.u32 %s2112_s14, 4  ;;  %p1864_p11 = pneg %p2207_p10  ;;  %s217_s15 = int_to_ptr.vmem [resolvable:$true] %s216_s15 }
  0x10   : > { %s2031_s16 = scalar_lea.vmem %s217_s15, 12288  ;;  %p2039_p3 = scmp.lt.s32.totalorder %s217_s15, %s217_s15 }
  0x11   : > { %p1865_p12 = pnand %p1872_p9, %p1864_p11  ;;  %p2032_p0 = scmp.ne.s32.totalorder %s217_s15, %s2031_s16 }
  0x12   : > { %p2040_p4 = scmp.lt.s32.totalorder %s2031_s16, %s2031_s16 }
  0x13   : > { %p2022_p13 = pneg %p1865_p12 }
  0x14   : > { %p2041_p6 = por %p2040_p4, %p2039_p3 }
  0x15   : > { %p2034_p1 = pnand %p2032_p0, %p2022_p13 }
  0x17   : > { %p2035_p2 = pneg %p2034_p1 }
  0x19   : > { %p2042_p7 = pnand %p2041_p6, %p2035_p2 }
  0x1b   : > { %2045 = shalt.err (!%p2042_p7)
}
  0x1c   : > { %s2113_s17 = smov 64   ;;  %s2114_s18 = smov 4  }
  0x1d   : > { %1867 = dma.hbm_to_vmem [thread:$0]  (!%p1865_p12), %s2314_s1, 12288, %s217_s15, [#allocation3], %s2113_s17, %s2113_s17, %s2114_s18  }
  0x1e   : > { %255 = sbr.rel (%p2207_p10) target bundleno = 883 (0x373), region = 48 }
  0x23   : > { %2089 = dma.done.wait (%p1872_p9), [#allocation3], 12288  }
  0x24   : > { %2091 = vsyncadd (%p1872_p9), [#allocation3], 4294955008  ;;  %v1912_v0 = vld [vmem:[#allocation2 + $0x78] sm:$0xff]   ;;  %v1916_v4 = vld [vmem:[#allocation2 + $0x70] sm:$0xff]   ;;  %p287_p6 = scmp.lt.s32.totalorder %s2179_s28, 1  ;;  %vm2116_vm0 = vmmov 0  }
  0x25   : > { %v1913_v1 = vld [vmem:[#allocation2 + $0xf8] sm:$0xff]   ;;  %1696 = vmatprep.subr.bf16.mxu0 %v1912_v0  ;;  %v1917_v5 = vld [vmem:[#allocation2 + $0xf0] sm:$0xff]   ;;  %v1920_v8 = vld [vmem:[#allocation2 + $0x68] sm:$0xff]   ;;  %s284_s18 = sand.u32 1, %s2102_s25   ;;  %s1693_s29 = sshll.u32 %s2179_s28, 7 }
  0x26   : > { %v1914_v2 = vld [vmem:[#allocation2 + $0x38] sm:$0xff]   ;;  %1718 = vmatprep.subr.bf16.mxu1 %v1913_v1  ;;  %v1918_v6 = vld [vmem:[#allocation2 + $0x30] sm:$0xff]   ;;  %v1921_v9 = vld [vmem:[#allocation2 + $0xe8] sm:$0xff]   ;;  %s288_s21 = scalar_select %p287_p6, %s2179_s28, 1 }
  0x27   : > { %v1915_v3 = vld [vmem:[#allocation2 + $0xb8] sm:$0xff]   ;;  %1697 = vmatpush3.bf16.msra.mxu0 %v1914_v2  ;;  %v1919_v7 = vld [vmem:[#allocation2 + $0xb0] sm:$0xff]   ;;  %v1922_v10 = vld [vmem:[#allocation2 + $0x28] sm:$0xff]   ;;  %s1582_s19 = sshll.u32 %s284_s18, 3  ;;  %s1503_s15 = scalar_lea.hbm %s2320_s7, %s1693_s29 }
  0x28   : > { %1719 = vmatpush3.bf16.msra.mxu1 %v1915_v3  ;;  %1698 = vmatprep.subr.bf16.mxu0 %v1916_v4  ;;  %v1923_v11 = vld [vmem:[#allocation2 + $0xa8] sm:$0xff]   ;;  %v1924_v12 = vld [vmem:[#allocation2 + $0x60] sm:$0xff]   ;;  %v1928_v16 = vld [vmem:[#allocation2 + $0x58] sm:$0xff]   ;;  %s1857_s22 = smul.u32 96, %s288_s21  ;;  %s1492_s16 = scalar_lea.sflag [#allocation4], %s284_s18 }
  0x29   : > { %1720 = vmatprep.subr.bf16.mxu1 %v1917_v5  ;;  %v1925_v13 = vld [vmem:[#allocation2 + $0xe0] sm:$0xff]   ;;  %v1929_v17 = vld [vmem:[#allocation2 + $0xd8] sm:$0xff]   ;;  %v1932_v20 = vld [vmem:[#allocation2 + $0x50] sm:$0xff]   ;;  %s2117_s20 = smov [#allocation5]  }
  0x2a   : > { %v1926_v14 = vld [vmem:[#allocation2 + $0x20] sm:$0xff]   ;;  %v1930_v18 = vld [vmem:[#allocation2 + $0x18] sm:$0xff]   ;;  %v1933_v21 = vld [vmem:[#allocation2 + $0xd0] sm:$0xff]   ;;  %s2229_s8 = scalar_lea.vmem %s2313_s0, %s1857_s22  ;;  %s2050_s21 = sshll.u32 %s2117_s20, 4  ;;  %s2051_s21 = int_to_ptr.vmem [resolvable:$false] %s2050_s21 }
  0x2b   : > { %1699 = vmatpush3.bf16.msra.mxu0 %v1918_v6  ;;  %v1927_v15 = vld [vmem:[#allocation2 + $0xa0] sm:$0xff]   ;;  %v1931_v19 = vld [vmem:[#allocation2 + $0x98] sm:$0xff]   ;;  %v1934_v22 = vld [vmem:[#allocation2 + $0x10] sm:$0xff]   ;;  %s2052_s28 = scalar_lea.vmem %s2051_s21, 256 }
  0x2c   : > { %1721 = vmatpush3.bf16.msra.mxu1 %v1919_v7  ;;  %1700 = vmatprep.subr.bf16.mxu0 %v1920_v8  ;;  %v1935_v23 = vld [vmem:[#allocation2 + $0x90] sm:$0xff]   ;;  %v1936_v24 = vld [vmem:[#allocation2 + $0x48] sm:$0xff]   ;;  %v1940_v28 = vld [vmem:[#allocation2 + $0x40] sm:$0xff]  }
  0x2d   : > { %1722 = vmatprep.subr.bf16.mxu1 %v1921_v9  ;;  %v1937_v25 = vld [vmem:[#allocation2 + $0xc8] sm:$0xff]   ;;  %v1941_v29 = vld [vmem:[#allocation2 + $0xc0] sm:$0xff]   ;;  %v296_v33 = vld [vmem:[%s2229_s8 + $0x18] sm:$0xff] }
  0x2e   : > { %v1938_v26 = vld [vmem:[#allocation2 + $0x8] sm:$0xff]   ;;  %v1942_v30 = vld [vmem:[#allocation2] sm:$0xff]   ;;  %v308_v36 = vpack.c.bf16 %v296_v33, %v296_v33  ;;  %v295_v38 = vld [vmem:[%s2229_s8 + $0x10] sm:$0xff] }
  0x2f   : > { %1701 = vmatpush3.bf16.msra.mxu0 %v1922_v10  ;;  %v1939_v27 = vld [vmem:[#allocation2 + $0x88] sm:$0xff]   ;;  %v1943_v31 = vld [vmem:[#allocation2 + $0x80] sm:$0xff]   ;;  %v307_v39 = vpack.c.bf16 %v295_v38, %v295_v38  ;;  %v1944_v40 = vld [vmem:[#allocation2 + $0x178] sm:$0xff]  }
  0x30   : > { %1723 = vmatpush3.bf16.msra.mxu1 %v1923_v11  ;;  %1702 = vmatprep.subr.bf16.mxu0 %v1924_v12  ;;  %v294_v32 = vld [vmem:[%s2229_s8 + $0x8] sm:$0xff]  ;;  %v293_v34 = vld [vmem:[%s2229_s8] sm:$0xff]  ;;  %v1945_v41 = vld [vmem:[#allocation2 + $0x1f8] sm:$0xff]  }
  0x31   : > { %1724 = vmatprep.subr.bf16.mxu1 %v1925_v13  ;;  %v306_v35 = vpack.c.bf16 %v294_v32, %v294_v32  ;;  %v305_v37 = vpack.c.bf16 %v293_v34, %v293_v34  ;;  %1157 = vmatprep.mubr.bf16.mxu1 %v308_v36  ;;  %v1946_v42 = vld [vmem:[#allocation2 + $0x138] sm:$0xff]   ;;  %v1948_v44 = vld [vmem:[#allocation2 + $0x170] sm:$0xff]   ;;  %v1952_v48 = vld [vmem:[#allocation2 + $0x168] sm:$0xff]  }
  0x32   : > { %v1947_v43 = vld [vmem:[#allocation2 + $0x1b8] sm:$0xff]   ;;  %v1949_v45 = vld [vmem:[#allocation2 + $0x1f0] sm:$0xff]   ;;  %v1953_v49 = vld [vmem:[#allocation2 + $0x1e8] sm:$0xff]  }
  0x33   : > { %1703 = vmatpush3.bf16.msra.mxu0 %v1926_v14  ;;  %1117 = vmatprep.mubr.bf16.mxu0 %v306_v35  ;;  %v1950_v46 = vld [vmem:[#allocation2 + $0x130] sm:$0xff]   ;;  %v1954_v50 = vld [vmem:[#allocation2 + $0x128] sm:$0xff]   ;;  %v1956_v52 = vld [vmem:[#allocation2 + $0x160] sm:$0xff]  }
  0x34   : > { %1725 = vmatpush3.bf16.msra.mxu1 %v1927_v15  ;;  %1704 = vmatprep.subr.bf16.mxu0 %v1928_v16  ;;  %v1951_v47 = vld [vmem:[#allocation2 + $0x1b0] sm:$0xff]   ;;  %v1955_v51 = vld [vmem:[#allocation2 + $0x1a8] sm:$0xff]   ;;  %v1957_v53 = vld [vmem:[#allocation2 + $0x1e0] sm:$0xff]  }
  0x35   : > { %1726 = vmatprep.subr.bf16.mxu1 %v1929_v17  ;;  %v1958_v54 = vld [vmem:[#allocation2 + $0x120] sm:$0xff]   ;;  %v1960_v56 = vld [vmem:[#allocation2 + $0x158] sm:$0xff]   ;;  %v1964_v60 = vld [vmem:[#allocation2 + $0x150] sm:$0xff]  }
  0x36   : > { %v1959_v55 = vld [vmem:[#allocation2 + $0x1a0] sm:$0xff]   ;;  %v1961_v57 = vld [vmem:[#allocation2 + $0x1d8] sm:$0xff]   ;;  %v1965_v61 = vld [vmem:[#allocation2 + $0x1d0] sm:$0xff]  }
  0x37   : > { %1705 = vmatpush3.bf16.msra.mxu0 %v1930_v18  ;;  %v1962_v58 = vld [vmem:[#allocation2 + $0x118] sm:$0xff]   ;;  %v1966_v62 = vld [vmem:[#allocation2 + $0x110] sm:$0xff]   ;;  %v1968_v0 = vld [vmem:[#allocation2 + $0x148] sm:$0xff]  }
  0x38   : > { %1727 = vmatpush3.bf16.msra.mxu1 %v1931_v19  ;;  %1706 = vmatprep.subr.bf16.mxu0 %v1932_v20  ;;  %v1963_v59 = vld [vmem:[#allocation2 + $0x198] sm:$0xff]   ;;  %v1967_v63 = vld [vmem:[#allocation2 + $0x190] sm:$0xff]   ;;  %v1969_v1 = vld [vmem:[#allocation2 + $0x1c8] sm:$0xff]  }
  0x39   : > { %1728 = vmatprep.subr.bf16.mxu1 %v1933_v21  ;;  %v1970_v2 = vld [vmem:[#allocation2 + $0x108] sm:$0xff]   ;;  %v1972_v4 = vld [vmem:[#allocation2 + $0x140] sm:$0xff]   ;;  %v300_v9 = vld [vmem:[%s2229_s8 + $0x38] sm:$0xff] }
  0x3a   : > { %v1971_v3 = vld [vmem:[#allocation2 + $0x188] sm:$0xff]   ;;  %v1973_v5 = vld [vmem:[#allocation2 + $0x1c0] sm:$0xff]   ;;  %v312_v11 = vpack.c.bf16 %v300_v9, %v300_v9  ;;  %v299_v13 = vld [vmem:[%s2229_s8 + $0x30] sm:$0xff] }
  0x3b   : > { %1707 = vmatpush3.bf16.msra.mxu0 %v1934_v22  ;;  %v1974_v6 = vld [vmem:[#allocation2 + $0x100] sm:$0xff]   ;;  %v298_v8 = vld [vmem:[%s2229_s8 + $0x28] sm:$0xff]  ;;  %v311_v15 = vpack.c.bf16 %v299_v13, %v299_v13  ;;  %v1976_v16 = vld [vmem:[#allocation2 + $0x278] sm:$0xff]  }
  0x3c   : > { %1729 = vmatpush3.bf16.msra.mxu1 %v1935_v23  ;;  %1708 = vmatprep.subr.bf16.mxu0 %v1936_v24  ;;  %v1975_v7 = vld [vmem:[#allocation2 + $0x180] sm:$0xff]   ;;  %v310_v10 = vpack.c.bf16 %v298_v8, %v298_v8  ;;  %v1977_v17 = vld [vmem:[#allocation2 + $0x2f8] sm:$0xff]   ;;  %v1980_v20 = vld [vmem:[#allocation2 + $0x270] sm:$0xff]  }
  0x3d   : > { %1730 = vmatprep.subr.bf16.mxu1 %v1937_v25  ;;  %v297_v12 = vld [vmem:[%s2229_s8 + $0x20] sm:$0xff]  ;;  %v1978_v18 = vld [vmem:[#allocation2 + $0x238] sm:$0xff]   ;;  %v1981_v21 = vld [vmem:[#allocation2 + $0x2f0] sm:$0xff]  }
  0x3e   : > { %v309_v14 = vpack.c.bf16 %v297_v12, %v297_v12  ;;  %v1979_v19 = vld [vmem:[#allocation2 + $0x2b8] sm:$0xff]   ;;  %v1982_v22 = vld [vmem:[#allocation2 + $0x230] sm:$0xff]   ;;  %v1984_v24 = vld [vmem:[#allocation2 + $0x268] sm:$0xff]  }
  0x3f   : > { %1709 = vmatpush3.bf16.msra.mxu0 %v1938_v26  ;;  %v1983_v23 = vld [vmem:[#allocation2 + $0x2b0] sm:$0xff]   ;;  %v1985_v25 = vld [vmem:[#allocation2 + $0x2e8] sm:$0xff]   ;;  %v1992_v32 = vld [vmem:[#allocation2 + $0x258] sm:$0xff]  }
  0x40   : > { %1731 = vmatpush3.bf16.msra.mxu1 %v1939_v27  ;;  %1710 = vmatprep.subr.bf16.mxu0 %v1940_v28  ;;  %v1986_v26 = vld [vmem:[#allocation2 + $0x228] sm:$0xff]   ;;  %v1988_v28 = vld [vmem:[#allocation2 + $0x260] sm:$0xff]   ;;  %v1993_v33 = vld [vmem:[#allocation2 + $0x2d8] sm:$0xff]  }
  0x41   : > { %1732 = vmatprep.subr.bf16.mxu1 %v1941_v29  ;;  %v1987_v27 = vld [vmem:[#allocation2 + $0x2a8] sm:$0xff]   ;;  %v1989_v29 = vld [vmem:[#allocation2 + $0x2e0] sm:$0xff]   ;;  %v1994_v34 = vld [vmem:[#allocation2 + $0x218] sm:$0xff]  }
  0x42   : > { %v1995_v35 = vld [vmem:[#allocation2 + $0x298] sm:$0xff]   ;;  %v1996_v36 = vld [vmem:[#allocation2 + $0x250] sm:$0xff]  }
  0x43   : > { %1711 = vmatpush3.bf16.msra.mxu0 %v1942_v30  ;;  %v1990_v30 = vld [vmem:[#allocation2 + $0x220] sm:$0xff]   ;;  %v1998_v38 = vld [vmem:[#allocation2 + $0x210] sm:$0xff]  }
  0x44   : > { %1733 = vmatpush3.bf16.msra.mxu1 %v1943_v31  ;;  %1740 = vmatprep.subr.bf16.mxu0 %v1944_v40  ;;  %v1991_v31 = vld [vmem:[#allocation2 + $0x2a0] sm:$0xff]   ;;  %v2000_v40 = vld [vmem:[#allocation2 + $0x248] sm:$0xff]  }
  0x45   : > { %1762 = vmatprep.subr.bf16.mxu1 %v1945_v41  ;;  %v2001_v41 = vld [vmem:[#allocation2 + $0x2c8] sm:$0xff]  }
  0x46   : > { %1118 = vmatmul.mubr.bf16.vlgmr.msra.gmra.mxu0 %v305_v37  ;;  %v1997_v37 = vld [vmem:[#allocation2 + $0x2d0] sm:$0xff]  }
  0x47   : > { %1158 = vmatmul.mubr.bf16.vlgmr.msra.gmra.mxu1 %v307_v39  ;;  %1741 = vmatpush3.bf16.msra.mxu0 %v1946_v42  ;;  %v1999_v39 = vld [vmem:[#allocation2 + $0x290] sm:$0xff]   ;;  %v2002_v42 = vld [vmem:[#allocation2 + $0x208] sm:$0xff]  }
  0x48   : > { %1763 = vmatpush3.bf16.msra.mxu1 %v1947_v43  ;;  %1742 = vmatprep.subr.bf16.mxu0 %v1948_v44  ;;  %v2003_v43 = vld [vmem:[#allocation2 + $0x288] sm:$0xff]   ;;  %v2004_v44 = vld [vmem:[#allocation2 + $0x240] sm:$0xff]  }
  0x49   : > { %1764 = vmatprep.subr.bf16.mxu1 %v1949_v45  ;;  %1197 = vmatprep.mubr.bf16.mxu0 %v310_v10  ;;  %v2005_v45 = vld [vmem:[#allocation2 + $0x2c0] sm:$0xff]  }
  0x4a   : > { %1237 = vmatprep.mubr.bf16.mxu1 %v312_v11 }
  0x4b   : > { %1743 = vmatpush3.bf16.msra.mxu0 %v1950_v46  ;;  %v2006_v46 = vld [vmem:[#allocation2 + $0x200] sm:$0xff]  }
  0x4c   : > { %1765 = vmatpush3.bf16.msra.mxu1 %v1951_v47  ;;  %1744 = vmatprep.subr.bf16.mxu0 %v1952_v48  ;;  %v2007_v47 = vld [vmem:[#allocation2 + $0x280] sm:$0xff]   ;;  %v302_v48 = vld [vmem:[%s2229_s8 + $0x48] sm:$0xff] }
  0x4d   : > { %1766 = vmatprep.subr.bf16.mxu1 %v1953_v49  ;;  %v314_v49 = vpack.c.bf16 %v302_v48, %v302_v48  ;;  %v1681_v48 = vld [vmem:[%s2316_s3] ss:$0 sm:$0xff] }
  0x4f   : > { %1745 = vmatpush3.bf16.msra.mxu0 %v1954_v50  ;;  %v304_v50 = vld [vmem:[%s2229_s8 + $0x58] sm:$0xff] }
  0x50   : > { %1767 = vmatpush3.bf16.msra.mxu1 %v1955_v51  ;;  %1746 = vmatprep.subr.bf16.mxu0 %v1956_v52  ;;  %v301_v51 = vld [vmem:[%s2229_s8 + $0x40] sm:$0xff]  ;;  %v303_v52 = vld [vmem:[%s2229_s8 + $0x50] sm:$0xff]  ;;  %s286_s8 = scalar_lea.vmem [#allocation5], %s1582_s19 }
  0x51   : > { %1768 = vmatprep.subr.bf16.mxu1 %v1957_v53  ;;  %v316_v53 = vpack.c.bf16 %v304_v50, %v304_v50  ;;  %s1505_s9 = sshll.u32 %s286_s8, 4  ;;  %s1506_s9 = int_to_ptr.vmem [resolvable:$true] %s1505_s9 }
  0x52   : > { %s2046_s17 = scalar_lea.vmem %s1506_s9, 128  ;;  %p2053_p11 = scmp.lt.s32.totalorder %s1506_s9, %s2051_s21 }
  0x53   : > { %1747 = vmatpush3.bf16.msra.mxu0 %v1958_v54  ;;  %v313_v54 = vpack.c.bf16 %v301_v51, %v301_v51  ;;  %p2047_p8 = scmp.ne.s32.totalorder %s1506_s9, %s2046_s17  ;;  %p2054_p12 = scmp.lt.s32.totalorder %s2052_s28, %s2046_s17 }
  0x54   : > { %1769 = vmatpush3.bf16.msra.mxu1 %v1959_v55  ;;  %1748 = vmatprep.subr.bf16.mxu0 %v1960_v56  ;;  %v315_v55 = vpack.c.bf16 %v303_v52, %v303_v52 }
  0x55   : > { %1770 = vmatprep.subr.bf16.mxu1 %v1961_v57  ;;  %p2048_p9 = pnand %p2047_p8, %p2196_p5  ;;  %p2055_p13 = por %p2054_p12, %p2053_p11 }
  0x57   : > { %1749 = vmatpush3.bf16.msra.mxu0 %v1962_v58  ;;  %p2049_p10 = pneg %p2048_p9 }
  0x58   : > { %1771 = vmatpush3.bf16.msra.mxu1 %v1963_v59  ;;  %1750 = vmatprep.subr.bf16.mxu0 %v1964_v60 }
  0x59   : > { %1772 = vmatprep.subr.bf16.mxu1 %v1965_v61  ;;  %p2056_p0 = pnand %p2055_p13, %p2049_p10 }
  0x5b   : > { %1751 = vmatpush3.bf16.msra.mxu0 %v1966_v62 }
  0x5c   : > { %1773 = vmatpush3.bf16.msra.mxu1 %v1967_v63  ;;  %1752 = vmatprep.subr.bf16.mxu0 %v1968_v0 }
  0x5d   : > { %1774 = vmatprep.subr.bf16.mxu1 %v1969_v1 }
  0x5f   : > { %1753 = vmatpush3.bf16.msra.mxu0 %v1970_v2 }
  0x60   : > { %1775 = vmatpush3.bf16.msra.mxu1 %v1971_v3  ;;  %1754 = vmatprep.subr.bf16.mxu0 %v1972_v4 }
  0x61   : > { %1776 = vmatprep.subr.bf16.mxu1 %v1973_v5 }
  0x63   : > { %1755 = vmatpush3.bf16.msra.mxu0 %v1974_v6 }
  0x64   : > { %1777 = vmatpush3.bf16.msra.mxu1 %v1975_v7  ;;  %1784 = vmatprep.subr.bf16.mxu0 %v1976_v16 }
  0x65   : > { %1806 = vmatprep.subr.bf16.mxu1 %v1977_v17 }
  0x66   : > { %1198 = vmatmul.mubr.bf16.vlgmr.msra.gmra.mxu0 %v309_v14 }
  0x67   : > { %1238 = vmatmul.mubr.bf16.vlgmr.msra.gmra.mxu1 %v311_v15  ;;  %1785 = vmatpush3.bf16.msra.mxu0 %v1978_v18 }
  0x68   : > { %1807 = vmatpush3.bf16.msra.mxu1 %v1979_v19  ;;  %1786 = vmatprep.subr.bf16.mxu0 %v1980_v20 }
  0x69   : > { %1808 = vmatprep.subr.bf16.mxu1 %v1981_v21  ;;  %1277 = vmatprep.mubr.bf16.mxu0 %v314_v49 }
  0x6a   : > { %1317 = vmatprep.mubr.bf16.mxu1 %v316_v53 }
  0x6b   : > { %1787 = vmatpush3.bf16.msra.mxu0 %v1982_v22 }
  0x6c   : > { %1809 = vmatpush3.bf16.msra.mxu1 %v1983_v23  ;;  %1788 = vmatprep.subr.bf16.mxu0 %v1984_v24 }
  0x6d   : > { %1810 = vmatprep.subr.bf16.mxu1 %v1985_v25 }
  0x6f   : > { %1789 = vmatpush3.bf16.msra.mxu0 %v1986_v26 }
  0x70   : > { %1811 = vmatpush3.bf16.msra.mxu1 %v1987_v27  ;;  %1790 = vmatprep.subr.bf16.mxu0 %v1988_v28  ;;  %v2008_v28 = vld [vmem:[%s2317_s4 + $0x38] sm:$0xff]  }
  0x71   : > { %1812 = vmatprep.subr.bf16.mxu1 %v1989_v29  ;;  %v2115_v29 = vmov 0.0  }
  0x73   : > { %1791 = vmatpush3.bf16.msra.mxu0 %v1990_v30  ;;  %v2009_v30 = vld [vmem:[%s2317_s4 + $0x30] sm:$0xff]  }
  0x74   : > { %1813 = vmatpush3.bf16.msra.mxu1 %v1991_v31  ;;  %1792 = vmatprep.subr.bf16.mxu0 %v1992_v32  ;;  %v2010_v31 = vld [vmem:[%s2317_s4 + $0x28] sm:$0xff]   ;;  %v2011_v32 = vld [vmem:[%s2317_s4 + $0x20] sm:$0xff]  }
  0x75   : > { %1814 = vmatprep.subr.bf16.mxu1 %v1993_v33  ;;  %v2012_v33 = vld [vmem:[%s2317_s4 + $0x18] sm:$0xff]  }
  0x77   : > { %1793 = vmatpush3.bf16.msra.mxu0 %v1994_v34  ;;  %v2013_v34 = vld [vmem:[%s2317_s4 + $0x10] sm:$0xff]  }
  0x78   : > { %1815 = vmatpush3.bf16.msra.mxu1 %v1995_v35  ;;  %1794 = vmatprep.subr.bf16.mxu0 %v1996_v36  ;;  %v2014_v35 = vld [vmem:[%s2317_s4 + $0x8] sm:$0xff]   ;;  %v2015_v36 = vld [vmem:[%s2317_s4] sm:$0xff]  }
  0x79   : > { %1816 = vmatprep.subr.bf16.mxu1 %v1997_v37 }
  0x7b   : > { %1795 = vmatpush3.bf16.msra.mxu0 %v1998_v38 }
  0x7c   : > { %1817 = vmatpush3.bf16.msra.mxu1 %v1999_v39  ;;  %1796 = vmatprep.subr.bf16.mxu0 %v2000_v40 }
  0x7d   : > { %1818 = vmatprep.subr.bf16.mxu1 %v2001_v41 }
  0x7f   : > { %1797 = vmatpush3.bf16.msra.mxu0 %v2002_v42 }
  0x80   : > { %1819 = vmatpush3.bf16.msra.mxu1 %v2003_v43  ;;  %1798 = vmatprep.subr.bf16.mxu0 %v2004_v44 }
  0x81   : > { %1820 = vmatprep.subr.bf16.mxu1 %v2005_v45 }
  0x83   : > { %1799 = vmatpush3.bf16.msra.mxu0 %v2006_v46  ;;  %v1680_v46 = vld [vmem:[%s2315_s2] ss:$0 sm:$0xff] }
  0x84   : > { %1821 = vmatpush3.bf16.msra.mxu1 %v2007_v47  ;;  %1837 = vmatprep.subr.bf16.mxu0 %v2115_v29 }
  0x86   : > { %1278 = vmatmul.mubr.bf16.vlgmr.msra.gmra.mxu0 %v313_v54 }
  0x87   : > { %1318 = vmatmul.mubr.bf16.vlgmr.msra.gmra.mxu1 %v315_v55  ;;  %1838 = vmatpush3.bf16.msra.mxu0 %v2008_v28 }
  0x88   : > { %1839 = vmatprep.subr.bf16.mxu0 %v2115_v29  ;;  %1853 = vmatprep.mubr.msk.bf16.mxu0 %vm2116_vm0, %v2115_v29 }
  0x8b   : > { %1840 = vmatpush3.bf16.msra.mxu0 %v2009_v30 }
  0x8c   : > { %1841 = vmatprep.subr.bf16.mxu0 %v2115_v29 }
  0x8f   : > { %1842 = vmatpush3.bf16.msra.mxu0 %v2010_v31 }
  0x90   : > { %1843 = vmatprep.subr.bf16.mxu0 %v2115_v29 }
  0x93   : > { %1844 = vmatpush3.bf16.msra.mxu0 %v2011_v32 }
  0x94   : > { %1845 = vmatprep.subr.bf16.mxu0 %v2115_v29 }
  0x97   : > { %1846 = vmatpush3.bf16.msra.mxu0 %v2012_v33 }
  0x98   : > { %1847 = vmatprep.subr.bf16.mxu0 %v2115_v29 }
  0x9b   : > { %1848 = vmatpush3.bf16.msra.mxu0 %v2013_v34 }
  0x9c   : > { %1849 = vmatprep.subr.bf16.mxu0 %v2115_v29 }
  0x9f   : > { %1850 = vmatpush3.bf16.msra.mxu0 %v2014_v35 }
  0xa0   : > { %1851 = vmatprep.subr.bf16.mxu0 %v2115_v29 }
  0xa3   : > { %1852 = vmatpush3.bf16.msra.mxu0 %v2015_v36 }
 0x106   : > { %v1712_v56 = vpop.f32.mrf.mxu0 }
 0x107   : > { %v1734_v57 = vpop.f32.mrf.mxu1 }
 0x108   : > { %v1713_v58 = vpop.f32.mrf.mxu0 }
 0x109   : > { %v1735_v59 = vpop.f32.mrf.mxu1  ;;  %v1714_v8 = vadd.f32 %v1713_v58, %v1712_v56 }
 0x10a   : > { %v1715_v60 = vpop.f32.mrf.mxu0  ;;  %v1736_v9 = vadd.f32 %v1735_v59, %v1734_v57 }
 0x10b   : > { %v1737_v61 = vpop.f32.mrf.mxu1 }
 0x10c   : > { %v1716_v62 = vpop.f32.mrf.mxu0  ;;  %v1160_v11 = vadd.f32 %v1736_v9, %v1714_v8 }
 0x10d   : > { %v1738_v63 = vpop.f32.mrf.mxu1 }
 0x126   : > { %v1756_v0 = vpop.f32.mrf.mxu0 }
 0x127   : > { %v1778_v1 = vpop.f32.mrf.mxu1 }
 0x128   : > { %v1757_v2 = vpop.f32.mrf.mxu0 }
 0x129   : > { %v1779_v3 = vpop.f32.mrf.mxu1  ;;  %v1758_v10 = vadd.f32 %v1757_v2, %v1756_v0 }
 0x12a   : > { %v1759_v4 = vpop.f32.mrf.mxu0  ;;  %v1780_v13 = vadd.f32 %v1779_v3, %v1778_v1  ;;  %v1690_v3 = vld [vmem:[%s2318_s5] ss:$0 sm:$0xff] }
 0x12b   : > { %v1781_v5 = vpop.f32.mrf.mxu1  ;;  %v1200_v12 = vadd.f32 %v1758_v10, %v1160_v11 }
 0x12c   : > { %v1760_v6 = vpop.f32.mrf.mxu0  ;;  %v1691_v5 = vld [vmem:[%s2319_s6] ss:$0 sm:$0xff] }
 0x12d   : > { %v1782_v7 = vpop.f32.mrf.mxu1  ;;  %v1240_v17 = vadd.f32 %v1780_v13, %v1200_v12 }
 0x146   : > { %v1800_v14 = vpop.f32.mrf.mxu0 }
 0x147   : > { %v1822_v15 = vpop.f32.mrf.mxu1 }
 0x148   : > { %v1801_v16 = vpop.f32.mrf.mxu0 }
 0x149   : > { %v1802_v18 = vadd.f32 %v1801_v16, %v1800_v14  ;;  %v1823_v19 = vpop.f32.mrf.mxu1 }
 0x14a   : > { %v1803_v20 = vpop.f32.mrf.mxu0  ;;  %v1824_v22 = vadd.f32 %v1823_v19, %v1822_v15 }
 0x14b   : > { %v1280_v21 = vadd.f32 %v1802_v18, %v1240_v17  ;;  %v1825_v23 = vpop.f32.mrf.mxu1 }
 0x14c   : > { %v1804_v24 = vpop.f32.mrf.mxu0 }
 0x14d   : > { %v1320_v25 = vadd.f32 %v1824_v22, %v1280_v21  ;;  %v1826_v26 = vpop.f32.mrf.mxu1 }
 0x14f   : > { %1327 = vadd.xlane.f32.xlu0 %v1320_v25  ;;  %v1330_v27 = vmul.f32 %v1320_v25, %v1320_v25 }
 0x153   : > { %1331 = vadd.xlane.f32.xlu0 %v1330_v27 }
 0x1d8   : > { %v1328_v37 = vpop.xlane.xlu0 %1327 }
 0x1d9   : > { %v1329_v38 = vmul.f32 0.02, %v1328_v37 }
 0x1db   : > { %v1334_v40 = vmul.f32 %v1329_v38, %v1329_v38  ;;  %v1336_v44 = vsub.f32 %v1320_v25, %v1329_v38 }
 0x1dc   : > { %v1332_v39 = vpop.xlane.xlu0 %1331 }
 0x1dd   : > { %v1333_v41 = vmul.f32 0.02, %v1332_v39 }
 0x1df   : > { %v1335_v42 = vsub.f32 %v1333_v41, %v1334_v40 }
 0x1e1   : > { %v1337_v43 = vadd.f32 1e-05, %v1335_v42 }
 0x1e3   : > { %2016 = vrsqrt.f32 %v1337_v43 }
 0x1f0   : > { %v2017_v45 = vpop.eup %2016 }
 0x1f1   : > { %v1339_v47 = vmul.f32 %v2017_v45, %v1336_v44 }
 0x1f3   : > { %v1346_v49 = vmul.f32 %v1680_v46, %v1339_v47 }
 0x1f5   : > { %v1353_v50 = vadd.f32 %v1681_v48, %v1346_v49 }
 0x1f7   : > { %v1354_v51 = vmax.f32 %v1353_v50, 0.0 }
 0x1f9   : > { %v1355_v52 = vpack.c.bf16 %v1354_v51, %v1354_v51 }
 0x1fb   : > { %1854 = vmatmul.mubr.bf16.vlgmr.msra.gmra.mxu0 %v1355_v52 }
 0x2bb   : > { %v1454_v53 = vpop.f32.mrf.mxu0 }
 0x2bc   : > { %1462 = vadd.xlane.f32.xlu1 %v1454_v53  ;;  %v1465_v55 = vmul.f32 %v1454_v53, %v1454_v53 }
 0x2bd   : > { %v1855_v54 = vpop.f32.mrf.mxu0 }
 0x2bf   : > { %v1457_v56 = vpop.f32.mrf.mxu0 }
 0x2c0   : > { %1466 = vadd.xlane.f32.xlu1 %v1465_v55 }
 0x2c1   : > { %v1856_v57 = vpop.f32.mrf.mxu0 }
 0x345   : > { %v1463_v58 = vpop.xlane.xlu1 %1462 }
 0x346   : > { %v1464_v59 = vmul.f32 0.02, %v1463_v58 }
 0x348   : > { %v1469_v61 = vmul.f32 %v1464_v59, %v1464_v59  ;;  %v1471_v1 = vsub.f32 %v1454_v53, %v1464_v59 }
 0x349   : > { %v1467_v60 = vpop.xlane.xlu1 %1466 }
 0x34a   : > { %v1468_v62 = vmul.f32 0.02, %v1467_v60 }
 0x34c   : > { %v1470_v63 = vsub.f32 %v1468_v62, %v1469_v61 }
 0x34e   : > { %v1472_v0 = vadd.f32 1e-05, %v1470_v63 }
 0x350   : > { %2018 = vrsqrt.f32 %v1472_v0 }
 0x35d   : > { %v2019_v2 = vpop.eup %2018 }
 0x35e   : > { %v1474_v4 = vmul.f32 %v2019_v2, %v1471_v1 }
 0x360   : > { %v1481_v6 = vmul.f32 %v1690_v3, %v1474_v4 }
 0x362   : > { %v1488_v7 = vadd.f32 %v1691_v5, %v1481_v6 }
 0x364   : > { %v1489_v8 = vmax.f32 %v1488_v7, 0.0 }
 0x366   : > { %1490 = vst [vmem:[%s286_s8] sm:$0xff] %v1489_v8 }
 0x367   : > { %2059 = shalt.err (!%p2056_p0)
}
 0x368   : > { %s2060_s19 = scalar_lea.hbm %s1503_s15, 128  ;;  %s2064_s23 = scalar_lea.hbm %s2320_s7, 256 }
 0x369   : > { %p2061_p1 = scmp.ne.s32.totalorder %s1503_s15, %s2060_s19  ;;  %p2065_p4 = scmp.lt.s32.totalorder %s1503_s15, %s2320_s7 }
 0x36a   : > { %p2066_p7 = scmp.lt.s32.totalorder %s2064_s23, %s2060_s19 }
 0x36b   : > { %p2062_p2 = pnand %p2061_p1, %p2196_p5 }
 0x36c   : > { %p2067_p6 = por %p2066_p7, %p2065_p4 }
 0x36d   : > { %p2063_p3 = pneg %p2062_p2 }
 0x36f   : > { %p2068_p8 = pnand %p2067_p6, %p2063_p3 }
 0x371   : > { %2071 = shalt.err (!%p2068_p8)
}
 0x372   : > { %1862 = dma.vmem_to_hbm [thread:$0]  (%p2196_p5), %s1506_s9, 128, %s1503_s15, %s1492_s16  }
 0x373 PF: > { %p1874_p9 = scmp.ge.s32.totalorder %s2110_s27, 2  ;;  %s1517_s13 = sand.u32 1, %s2098_s24  }
 0x374   : > { %p2324_p10 = scmp.ne.s32.totalorder %s2322_s12, 0  ;;  %s1518_s14 = scalar_lea.sflag [#allocation4], %s1517_s13 }
 0x376   : > { %p1869_p11 = pnand %p1874_p9, %p2324_p10 }
 0x378   : > { %p1870_p12 = pneg %p1869_p11 }
 0x37a   : > { %2093 = dma.done.wait (%p1870_p12), %s1518_s14, 128  }
 0x37b   : > { %2095 = vsyncadd (%p1870_p12), %s1518_s14, 4294967168  ;;  %p18_p13 = scmp.ge.s32.totalorder %s2183_s30, 4   ;;  %s2325_s24 = smov %s2102_s25 }
 0x37c   : > { %s2326_s25 = smov %s2106_s26  ;;  %s2327_s26 = smov %s2194_s10 }
 0x37d   : > { %s2328_s27 = smov %s2183_s30  ;;  %20 = sbr.rel (!%p18_p13) target bundleno = 4 (0x4), region = 88 }
 0x382   :  { %1523 = vsyncpa [#allocation3], 1 }
 0x383   :  { %1525 = vsyncpa [#allocation3 + $0x1], 1 }
 0x384   :  { %1526 = vsyncpa [#allocation4], 1 }
 0x385   :  { %1528 = vsyncpa [#allocation4 + $0x1], 1 }

</bundles_post_ra>
